<compile_context>
chip_gen: v7x
topology: tpu7x:2x2x1
jax: 0.10.0
libtpu: 0.0.40
codegen_flags: <defaults>
</compile_context>

<pallas_src>
import math

import jax
import jax.numpy as jnp
from jax.experimental import pallas as pl
from jax.experimental.pallas import tpu as pltpu


def gae_kernel(x_ref, adj_ref, w_ref, c_ref, csq_ref, apred_ref, zq_ref):
    bt, n, f = x_ref.shape
    d = w_ref.shape[1]
    k = c_ref.shape[0]

    # --- GCN layer: leaky_relu(adj @ (x @ W)) --------------------------------
    # Shared-weight matmul on a flattened (Bt*N, F) LHS; bf16 operands, f32 acc.
    x2 = x_ref[...].reshape(bt * n, f).astype(jnp.bfloat16)
    w = w_ref[...].astype(jnp.bfloat16)
    xw = jnp.dot(x2, w, preferred_element_type=jnp.float32)          # (Bt*N, D)
    xw = xw.reshape(bt, n, d).astype(jnp.bfloat16)

    adj = adj_ref[...].astype(jnp.bfloat16)
    h = jnp.einsum("bij,bjd->bid", adj, xw,
                   preferred_element_type=jnp.float32)               # (Bt, N, D)
    # F.leaky_relu default negative_slope = 0.01
    h = jnp.maximum(h, 0.01 * h)

    # --- F.normalize(h, dim=1): h / max(||h||_2, 1e-12) ----------------------
    # == h * rsqrt(max(sum(h*h), 1e-24)); rsqrt runs on the EUP slot.
    sq = jnp.sum(h * h, axis=-1, keepdims=True)                      # (Bt, N, 1)
    inv = jax.lax.rsqrt(jnp.maximum(sq, 1e-24))
    z = h * inv                                                      # (Bt, N, D)
    zz = sq * inv * inv          # ||z||^2, reuses the reduction above

    z16 = z.astype(jnp.bfloat16)

    # --- A_pred = sigmoid(z @ z.T) -------------------------------------------
    # Batched contraction over D on the MXU; no explicit transpose.
    logits = jnp.einsum("bid,bjd->bij", z16, z16,
                        preferred_element_type=jnp.float32)          # (Bt, N, N)
    # TODO(synk): on v6e/v7x a bf16 sigmoid (bf16 EUP) roughly doubles
    # transcendental throughput at large N; kept f32 here for accuracy.
    apred_ref[...] = jax.nn.sigmoid(logits).astype(apred_ref.dtype)

    # --- q: student-t (v = 1) soft assignment --------------------------------
    # ||z_i - c_j||^2 = ||z_i||^2 + ||c_j||^2 - 2 z_i . c_j  (MXU form).
    c16 = c_ref[...].astype(jnp.bfloat16)
    zc = jax.lax.dot_general(                                        # (Bt*N, K)
        z16.reshape(bt * n, d), c16,
        dimension_numbers=(((1,), (1,)), ((), ())),
        preferred_element_type=jnp.float32,
    ).reshape(bt, n, k)
    cc = csq_ref[...].reshape(1, 1, k)                               # precomputed
    d2 = jnp.maximum(zz + cc - 2.0 * zc, 0.0)
    q = 1.0 / (1.0 + d2)                                             # v = 1
    # q ** ((v + 1) / 2) == q ** 1.0  -> identity for v = 1
    q = q / jnp.sum(q, axis=-1, keepdims=True)                       # row-normalize

    # --- pack z | q into one lane-dense slab ---------------------------------
    # Padded lanes are zeroed; the HBM writeback is one dense (Bt, N, 128)
    # block per step (no tiny masked 8-/4-lane output streams).
    zq_ref[...] = jnp.zeros(zq_ref.shape, zq_ref.dtype)
    zq_ref[:, :, :d] = z.astype(zq_ref.dtype)
    zq_ref[:, :, d:d + k] = q.astype(zq_ref.dtype)


def gae_forward_batched(x, adj, weight, centroid, *, graphs_per_block=None):
    """Batched forward: x (B,N,F), adj (B,N,N) -> (A_pred, z, q)."""
    b, n, f = x.shape
    d = weight.shape[1]
    k = centroid.shape[0]

    # Pick Bt: amortize per-step overhead while keeping grid extent >= 2
    # (so the "parallel" axis can use both TensorCores on v7x).
    bt = graphs_per_block
    if bt is None:
        bt = 1
        for cand in (16, 8, 4, 2):
            if b % cand == 0 and b // cand >= 2:
                bt = cand
                break
    assert b % bt == 0, "batch must be divisible by graphs_per_block"

    # ||c||^2 precomputed once (avoids a per-step cross-lane reduce + relayout).
    c_sq = jnp.sum(centroid.astype(jnp.float32) ** 2, axis=1).reshape(1, k)

    slab_w = max(128, ((d + k + 127) // 128) * 128)  # lane-dense z|q slab width

    grid = (b // bt,)
    in_specs = [
        pl.BlockSpec((bt, n, f), lambda i: (i, 0, 0)),     # x, Bt graphs/block
        pl.BlockSpec((bt, n, n), lambda i: (i, 0, 0)),     # adj
        pl.BlockSpec((f, d), lambda i: (0, 0)),            # W, shared
        pl.BlockSpec((k, d), lambda i: (0, 0)),            # centroid, shared
        pl.BlockSpec((1, k), lambda i: (0, 0)),            # ||c||^2, shared
    ]
    out_specs = (
        pl.BlockSpec((bt, n, n), lambda i: (i, 0, 0)),         # A_pred
        pl.BlockSpec((bt, n, slab_w), lambda i: (i, 0, 0)),    # packed z|q slab
    )
    out_shapes = (
        jax.ShapeDtypeStruct((b, n, n), jnp.float32),
        jax.ShapeDtypeStruct((b, n, slab_w), jnp.float32),
    )
    a_pred, zq = pl.pallas_call(
        gae_kernel,
        out_shape=out_shapes,
        grid=grid,
        in_specs=in_specs,
        out_specs=out_specs,
        compiler_params=pltpu.CompilerParams(
            dimension_semantics=("parallel",),
            # When scaling N (esp. on v5e's 16 MiB scoped default), also set
            # vmem_limit_bytes=... with headroom; unnecessary at these sizes.
        ),
    )(x, adj, weight, centroid, c_sq)

    z = zq[..., :d]
    q = zq[..., d:d + k]
    return a_pred, z, q


def gae_forward(x, adj, weight, centroid):
    """Single-graph forward (matches the PyTorch module): x (N,F), adj (N,N)."""
    a_pred, z, q = gae_forward_batched(x[None], adj[None], weight, centroid)
    return a_pred[0], z[0], q[0]


def gae_reference(x, adj, weight, centroid):
    """Pure-JAX f32 reference (mirrors the PyTorch forward)."""
    h = jnp.einsum("...ij,...jk->...ik", adj,
                   jnp.einsum("...nf,fd->...nd", x, weight))
    h = jnp.where(h > 0, h, 0.01 * h)
    norm = jnp.sqrt(jnp.sum(h * h, axis=-1, keepdims=True))
    z = h / jnp.maximum(norm, 1e-12)
    a_pred = jax.nn.sigmoid(jnp.einsum("...nd,...md->...nm", z, z))
    diff = z[..., :, None, :] - centroid[None, :, :]
    d2 = jnp.sum(diff * diff, axis=-1)
    q = 1.0 / (1.0 + d2)
    q = q / jnp.sum(q, axis=-1, keepdims=True)
    return a_pred, z, q


def init_params(key, feature_dim, encoded_dim, n_cluster):
    k_w, k_c = jax.random.split(key)
    # glorot_init: uniform in [-r, r], r = sqrt(6 / (in + out))
    r = math.sqrt(6.0 / (feature_dim + encoded_dim))
    weight = jax.random.uniform(
        k_w, (feature_dim, encoded_dim), jnp.float32, minval=-r, maxval=r
    )
    # xavier_normal_: N(0, std), std = sqrt(2 / (fan_in + fan_out))
    std = math.sqrt(2.0 / (n_cluster + encoded_dim))
    centroid = std * jax.random.normal(k_c, (n_cluster, encoded_dim), jnp.float32)
    return weight, centroid


if __name__ == "__main__":
    B, N, F_DIM, D_ENC, K_CLUSTER = 8, 32, 16, 8, 4

    key = jax.random.PRNGKey(0)
    k_x, k_adj, k_params = jax.random.split(key, 3)

    x = jax.random.normal(k_x, (B, N, F_DIM), jnp.float32)
    # symmetric, row-normalized dense adjacency with self loops
    a = (jax.random.uniform(k_adj, (B, N, N)) < 0.2).astype(jnp.float32)
    adj = jnp.minimum(a + jnp.swapaxes(a, -1, -2)
                      + jnp.eye(N, dtype=jnp.float32)[None], 1.0)
    adj = adj / jnp.sum(adj, axis=-1, keepdims=True)

    weight, centroid = init_params(k_params, F_DIM, D_ENC, K_CLUSTER)

    # Batched (grid) path: Bt=4 graphs per step -> grid extent 2.
    A_pred, z, q = gae_forward_batched(x, adj, weight, centroid)
    jax.block_until_ready((A_pred, z, q))

    # Single-graph convenience path (same kernel).
    A0, z0, q0 = gae_forward(x[0], adj[0], weight, centroid)
    jax.block_until_ready((A0, z0, q0))

    assert A_pred.shape == (B, N, N)
    assert z.shape == (B, N, D_ENC)
    assert q.shape == (B, N, K_CLUSTER)

    # Correctness vs. f32 pure-JAX reference of the PyTorch forward.
    # Tolerance accounts for bf16 MXU operands (f32 accumulation) in the kernel.
    A_exp, z_exp, q_exp = gae_reference(x, adj, weight, centroid)
    TOL = dict(atol=5e-2, rtol=5e-2)
    assert bool(jnp.allclose(A_pred, A_exp, **TOL))
    assert bool(jnp.allclose(z, z_exp, **TOL))
    assert bool(jnp.allclose(q, q_exp, **TOL))
    assert bool(jnp.allclose(A0, A_exp[0], **TOL))
    assert bool(jnp.allclose(z0, z_exp[0], **TOL))
    assert bool(jnp.allclose(q0, q_exp[0], **TOL))

    print("KERNEL_OK")
</pallas_src>

<mosaic_0001>
module attributes {stable_mosaic.version = 11 : i64} {
  func.func @gae_kernel(%arg0: i32, %arg1: memref<4x32x16xf32, #tpu.memory_space<vmem>>, %arg2: memref<4x32x32xf32, #tpu.memory_space<vmem>>, %arg3: memref<16x8xf32, #tpu.memory_space<vmem>>, %arg4: memref<4x8xf32, #tpu.memory_space<vmem>>, %arg5: memref<1x4xf32, #tpu.memory_space<vmem>>, %arg6: memref<4x32x32xf32, #tpu.memory_space<vmem>>, %arg7: memref<4x32x128xf32, #tpu.memory_space<vmem>>) attributes {dimension_semantics = [#tpu.dimension_semantics<parallel>], iteration_bounds = array<i64: 2>, scalar_prefetch = 0 : i64, scratch_operands = 0 : i64, tpu.core_type = #tpu.core_type<tc>, window_params = [{transform_indices = @transform_0, window_bounds = array<i64: 4, 32, 16>}, {transform_indices = @transform_1, window_bounds = array<i64: 4, 32, 32>}, {pipeline_mode = #tpu.pipeline_mode<synchronous>, transform_indices = @transform_2, window_bounds = array<i64: 16, 8>}, {pipeline_mode = #tpu.pipeline_mode<synchronous>, transform_indices = @transform_3, window_bounds = array<i64: 4, 8>}, {pipeline_mode = #tpu.pipeline_mode<synchronous>, transform_indices = @transform_4, window_bounds = array<i64: 1, 4>}, {transform_indices = @transform_5, window_bounds = array<i64: 4, 32, 32>}, {transform_indices = @transform_6, window_bounds = array<i64: 4, 32, 128>}]} {
    %c0 = arith.constant 0 : index
    %c0_0 = arith.constant 0 : index
    %c0_1 = arith.constant 0 : index
    %0 = vector.load %arg1[%c0, %c0_0, %c0_1] : memref<4x32x16xf32, #tpu.memory_space<vmem>>, vector<4x32x16xf32>
    %1 = vector.shape_cast %0 : vector<4x32x16xf32> to vector<128x16xf32>
    %2 = arith.truncf %1 : vector<128x16xf32> to vector<128x16xbf16>
    %c0_2 = arith.constant 0 : index
    %c0_3 = arith.constant 0 : index
    %3 = vector.load %arg3[%c0_2, %c0_3] : memref<16x8xf32, #tpu.memory_space<vmem>>, vector<16x8xf32>
    %4 = arith.truncf %3 : vector<16x8xf32> to vector<16x8xbf16>
    %cst = arith.constant dense<0.000000e+00> : vector<128x8xf32>
    %5 = tpu.matmul %2, %4, %cst {dimension_numbers = #tpu.dot_dimension_numbers<[1], [0], [0], [1], [0, 0, 1, 1], [], []>} : vector<128x16xbf16>, vector<16x8xbf16>, vector<128x8xf32> -> vector<128x8xf32>
    %6 = vector.shape_cast %5 : vector<128x8xf32> to vector<4x32x8xf32>
    %7 = arith.truncf %6 : vector<4x32x8xf32> to vector<4x32x8xbf16>
    %c0_4 = arith.constant 0 : index
    %c0_5 = arith.constant 0 : index
    %c0_6 = arith.constant 0 : index
    %8 = vector.load %arg2[%c0_4, %c0_5, %c0_6] : memref<4x32x32xf32, #tpu.memory_space<vmem>>, vector<4x32x32xf32>
    %9 = arith.truncf %8 : vector<4x32x32xf32> to vector<4x32x32xbf16>
    "tpu.trace_start"() <{level = 10 : i32, message = "bij,bjd->bid"}> : () -> ()
    %cst_7 = arith.constant dense<0.000000e+00> : vector<4x32x8xf32>
    %10 = tpu.matmul %9, %7, %cst_7 {dimension_numbers = #tpu.dot_dimension_numbers<[2], [1], [1], [2], [0, 0, 0, 1, 1, 2], [0], [0]>} : vector<4x32x32xbf16>, vector<4x32x8xbf16>, vector<4x32x8xf32> -> vector<4x32x8xf32>
    "tpu.trace_stop"() : () -> ()
    %cst_8 = arith.constant 0.00999999977 : f32
    %11 = vector.broadcast %cst_8 : f32 to vector<4x32x8xf32>
    %12 = arith.mulf %11, %10 : vector<4x32x8xf32>
    %13 = arith.maximumf %10, %12 : vector<4x32x8xf32>
    %14 = arith.mulf %13, %13 : vector<4x32x8xf32>
    %cst_9 = arith.constant dense<0.000000e+00> : vector<4x32xf32>
    %15 = vector.multi_reduction <add>, %14, %cst_9 [2] : vector<4x32x8xf32> to vector<4x32xf32>
    %16 = vector.shape_cast %15 : vector<4x32xf32> to vector<4x32x1xf32>
    %cst_10 = arith.constant 1.000000e-24 : f32
    %17 = vector.broadcast %cst_10 : f32 to vector<4x32x1xf32>
    %18 = arith.maximumf %16, %17 : vector<4x32x1xf32>
    %19 = math.rsqrt %18 : vector<4x32x1xf32>
    %20 = vector.broadcast %19 : vector<4x32x1xf32> to vector<4x32x8xf32>
    %21 = arith.mulf %13, %20 : vector<4x32x8xf32>
    %22 = arith.mulf %16, %19 : vector<4x32x1xf32>
    %23 = arith.mulf %22, %19 : vector<4x32x1xf32>
    %24 = arith.truncf %21 : vector<4x32x8xf32> to vector<4x32x8xbf16>
    "tpu.trace_start"() <{level = 10 : i32, message = "bid,bjd->bij"}> : () -> ()
    %cst_11 = arith.constant dense<0.000000e+00> : vector<4x32x32xf32>
    %25 = tpu.matmul %24, %24, %cst_11 {dimension_numbers = #tpu.dot_dimension_numbers<[2], [2], [1], [1], [0, 0, 0, 1, 1, 1], [0], [0]>} : vector<4x32x8xbf16>, vector<4x32x8xbf16>, vector<4x32x32xf32> -> vector<4x32x32xf32>
    "tpu.trace_stop"() : () -> ()
    %26 = arith.negf %25 : vector<4x32x32xf32>
    %27 = math.exp %26 : vector<4x32x32xf32>
    %cst_12 = arith.constant 1.000000e+00 : f32
    %28 = vector.broadcast %cst_12 : f32 to vector<4x32x32xf32>
    %29 = arith.addf %28, %27 : vector<4x32x32xf32>
    %30 = arith.divf %28, %29 : vector<4x32x32xf32>
    %c0_13 = arith.constant 0 : index
    %c0_14 = arith.constant 0 : index
    %c0_15 = arith.constant 0 : index
    %31 = vector.load %arg6[%c0_13, %c0_14, %c0_15] : memref<4x32x32xf32, #tpu.memory_space<vmem>>, vector<4x32x32xf32>
    tpu.vector_store %arg6[%c0_13, %c0_14, %c0_15], %30 {strides = array<i32>} : memref<4x32x32xf32, #tpu.memory_space<vmem>>, vector<4x32x32xf32>,
    %c0_16 = arith.constant 0 : index
    %c0_17 = arith.constant 0 : index
    %32 = vector.load %arg4[%c0_16, %c0_17] : memref<4x8xf32, #tpu.memory_space<vmem>>, vector<4x8xf32>
    %33 = arith.truncf %32 : vector<4x8xf32> to vector<4x8xbf16>
    %34 = vector.shape_cast %24 : vector<4x32x8xbf16> to vector<128x8xbf16>
    %cst_18 = arith.constant dense<0.000000e+00> : vector<128x4xf32>
    %35 = tpu.matmul %34, %33, %cst_18 {dimension_numbers = #tpu.dot_dimension_numbers<[1], [1], [0], [0], [0, 0, 1, 0], [], []>} : vector<128x8xbf16>, vector<4x8xbf16>, vector<128x4xf32> -> vector<128x4xf32>
    %36 = vector.shape_cast %35 : vector<128x4xf32> to vector<4x32x4xf32>
    %c0_19 = arith.constant 0 : index
    %c0_20 = arith.constant 0 : index
    %37 = vector.load %arg5[%c0_19, %c0_20] : memref<1x4xf32, #tpu.memory_space<vmem>>, vector<1x4xf32>
    %38 = vector.shape_cast %37 : vector<1x4xf32> to vector<1x1x4xf32>
    %39 = vector.broadcast %23 : vector<4x32x1xf32> to vector<4x32x4xf32>
    %40 = vector.broadcast %38 : vector<1x1x4xf32> to vector<4x32x4xf32>
    %41 = arith.addf %39, %40 : vector<4x32x4xf32>
    %cst_21 = arith.constant 2.000000e+00 : f32
    %42 = vector.broadcast %cst_21 : f32 to vector<4x32x4xf32>
    %43 = arith.mulf %42, %36 : vector<4x32x4xf32>
    %44 = arith.subf %41, %43 : vector<4x32x4xf32>
    %cst_22 = arith.constant 0.000000e+00 : f32
    %45 = vector.broadcast %cst_22 : f32 to vector<4x32x4xf32>
    %46 = arith.maximumf %44, %45 : vector<4x32x4xf32>
    %cst_23 = arith.constant 1.000000e+00 : f32
    %47 = vector.broadcast %cst_23 : f32 to vector<4x32x4xf32>
    %48 = arith.addf %47, %46 : vector<4x32x4xf32>
    %cst_24 = arith.constant 1.000000e+00 : f32
    %49 = vector.broadcast %cst_24 : f32 to vector<4x32x4xf32>
    %50 = arith.divf %49, %48 : vector<4x32x4xf32>
    %cst_25 = arith.constant dense<0.000000e+00> : vector<4x32xf32>
    %51 = vector.multi_reduction <add>, %50, %cst_25 [2] : vector<4x32x4xf32> to vector<4x32xf32>
    %52 = vector.shape_cast %51 : vector<4x32xf32> to vector<4x32x1xf32>
    %53 = vector.broadcast %52 : vector<4x32x1xf32> to vector<4x32x4xf32>
    %54 = arith.divf %50, %53 : vector<4x32x4xf32>
    %cst_26 = arith.constant 0.000000e+00 : f32
    %55 = vector.broadcast %cst_26 : f32 to vector<4x32x128xf32>
    %c0_27 = arith.constant 0 : index
    %c0_28 = arith.constant 0 : index
    %c0_29 = arith.constant 0 : index
    %56 = vector.load %arg7[%c0_27, %c0_28, %c0_29] : memref<4x32x128xf32, #tpu.memory_space<vmem>>, vector<4x32x128xf32>
    tpu.vector_store %arg7[%c0_27, %c0_28, %c0_29], %55 {strides = array<i32>} : memref<4x32x128xf32, #tpu.memory_space<vmem>>, vector<4x32x128xf32>,
    %c0_30 = arith.constant 0 : index
    %c0_31 = arith.constant 0 : index
    %c0_32 = arith.constant 0 : index
    %57 = vector.load %arg7[%c0_30, %c0_31, %c0_32] : memref<4x32x128xf32, #tpu.memory_space<vmem>>, vector<4x32x8xf32>
    tpu.vector_store %arg7[%c0_30, %c0_31, %c0_32], %21 {strides = array<i32>} : memref<4x32x128xf32, #tpu.memory_space<vmem>>, vector<4x32x8xf32>,
    %c0_33 = arith.constant 0 : index
    %c0_34 = arith.constant 0 : index
    %c8 = arith.constant 8 : index
    %58 = vector.load %arg7[%c0_33, %c0_34, %c8] : memref<4x32x128xf32, #tpu.memory_space<vmem>>, vector<4x32x4xf32>
    tpu.vector_store %arg7[%c0_33, %c0_34, %c8], %54 {strides = array<i32>} : memref<4x32x128xf32, #tpu.memory_space<vmem>>, vector<4x32x4xf32>,
    return
  }
  func.func @transform_0(%arg0: i32) -> (i32, i32, i32) {
    %c0_i32 = arith.constant 0 : i32
    %c0_i32_0 = arith.constant 0 : i32
    %c0_i32_1 = arith.constant 0 : i32
    return %arg0, %c0_i32, %c0_i32_0 : i32, i32, i32
  }
  func.func @transform_1(%arg0: i32) -> (i32, i32, i32) {
    %c0_i32 = arith.constant 0 : i32
    %c0_i32_0 = arith.constant 0 : i32
    %c0_i32_1 = arith.constant 0 : i32
    return %arg0, %c0_i32, %c0_i32_0 : i32, i32, i32
  }
  func.func @transform_2(%arg0: i32) -> (i32, i32) {
    %c0_i32 = arith.constant 0 : i32
    %c0_i32_0 = arith.constant 0 : i32
    %c0_i32_1 = arith.constant 0 : i32
    return %c0_i32, %c0_i32_0 : i32, i32
  }
  func.func @transform_3(%arg0: i32) -> (i32, i32) {
    %c0_i32 = arith.constant 0 : i32
    %c0_i32_0 = arith.constant 0 : i32
    %c0_i32_1 = arith.constant 0 : i32
    return %c0_i32, %c0_i32_0 : i32, i32
  }
  func.func @transform_4(%arg0: i32) -> (i32, i32) {
    %c0_i32 = arith.constant 0 : i32
    %c0_i32_0 = arith.constant 0 : i32
    %c0_i32_1 = arith.constant 0 : i32
    return %c0_i32, %c0_i32_0 : i32, i32
  }
  func.func @transform_5(%arg0: i32) -> (i32, i32, i32) {
    %c0_i32 = arith.constant 0 : i32
    %c0_i32_0 = arith.constant 0 : i32
    %c0_i32_1 = arith.constant 0 : i32
    return %arg0, %c0_i32, %c0_i32_0 : i32, i32, i32
  }
  func.func @transform_6(%arg0: i32) -> (i32, i32, i32) {
    %c0_i32 = arith.constant 0 : i32
    %c0_i32_0 = arith.constant 0 : i32
    %c0_i32_1 = arith.constant 0 : i32
    return %arg0, %c0_i32, %c0_i32_0 : i32, i32, i32
  }
}

</mosaic_0001>

<bundles_post_ra>
// kernel: tpu_custom_call.1
= control target key start
LH: loop header
LB: loop body
LE: loop exit
PB: predicated region body
PF: predicated region fallthrough
CT: control target
= control target key end

     0   :  { %12 = vsyncpa [#allocation3], 0  ;;  %s3023_s0 = inlined_call_operand.vmem [shape: f32[8,32,16], index: 0, kind: input, shape index: {}]   ;;  %s3024_s1 = inlined_call_operand.vmem [shape: f32[8,32,32], index: 1, kind: input, shape index: {}]   ;;  %s3025_s2 = inlined_call_operand.vmem [shape: f32[16,8], index: 2, kind: input, shape index: {}]   ;;  %s3026_s3 = inlined_call_operand.vmem [shape: f32[4,8], index: 3, kind: input, shape index: {}]   ;;  %s3027_s4 = inlined_call_operand.vmem [shape: f32[1,4], index: 4, kind: input, shape index: {}]   ;;  %s3028_s5 = inlined_call_operand.hbm [shape: f32[8,32,32], index: 5, kind: output, shape index: {0}]   ;;  %s3029_s6 = inlined_call_operand.hbm [shape: f32[8,32,128], index: 6, kind: output, shape index: {1}]  }
   0x1   :  { %14 = vsyncpa [#allocation3 + $0x1], 0 }
   0x2   :  { %15 = vsyncpa [#allocation5], 0 }
   0x3   :  { %17 = vsyncpa [#allocation5 + $0x1], 0  ;;  %s2352_s21 = smov 0   ;;  %s2354_s22 = smov 0  }
   0x4   :  { %s2356_s23 = smov 0   ;;  %s2358_s24 = smov 0  }
   0x5 LB: > { %s2373_s25 = sadd.s32 4294967295, %s2310_s24   ;;  %s1771_s26 = sadd.s32 4294967294, %s2310_s24   ;;  %s2310_s24 = sphi %s2358_s24, %s3035_s24   ;;  %s2306_s23 = sphi %s2356_s23, %s3034_s23   ;;  %s2302_s22 = sphi %s2354_s22, %s3033_s22   ;;  %s2298_s21 = sphi %s2352_s21, %s3032_s21  }
   0x6   : > { %s2377_s27 = sadd.s32 1, %s2310_s24   ;;  %s145_s28 = sadd.s32 1, %s2306_s23 }
   0x7   : > { %s142_s29 = ssub.s32 %s2310_s24, %s2377_s27  ;;  %p155_p0 = scmp.ne.s32.totalorder %s2306_s23, %s2302_s22 }
   0x8   : > { %p143_p1 = scmp.eq.s32.totalorder %s142_s29, 0  ;;  %p156_p2 = scmp.eq.s32.totalorder %s2373_s25, 1 }
   0x9   : > { %p161_p3 = scmp.ne.s32.totalorder %s2302_s22, %s2298_s21  ;;  %p162_p4 = scmp.eq.s32.totalorder %s1771_s26, 1 }
   0xa   : > { %s2388_s30 = scalar_select %p143_p1, %s2306_s23, %s145_s28  }
   0xb   : > { %p2390_p5 = por %p156_p2, %p155_p0  ;;  %p2394_p6 = por %p162_p4, %p161_p3 }
   0xc   : > { %p1774_p7 = scmp.ge.s32.totalorder %s2310_s24, 1  ;;  %p235_p8 = scmp.lt.s32.totalorder %s2310_s24, 3 }
   0xe   : > { %p236_p9 = pnand %p1774_p7, %p235_p8 }
   0xf   : > { %v318_v0 = vld [vmem:[%s3025_s2] sm:$0xff] (!%p236_p9)  ;;  %v319_v1 = vld [vmem:[%s3025_s2 + $0x8] sm:$0xff] (!%p236_p9)  ;;  %s1777_s13 = sshll.u32 (!%p236_p9), %s2373_s25, 2  ;;  %vm321_vm0 = vcmask (!%p236_p9), 130048   ;;  %vm475_vm1 = vcmask (!%p236_p9), 261120   ;;  %vm744_vm2 = vcmask (!%p236_p9), 64512  }
  0x10   : > { %239 = sbr.rel (%p236_p9) target bundleno = 1243 (0x4db), region = 40  ;;  %v320_v2 = vpack.c.bf16 (!%p236_p9), %v319_v1, %v318_v0  ;;  %p278_p10 = scmp.lt.s32.totalorder (!%p236_p9), %s1777_s13, 7  ;;  %vm1434_vm3 = vcmask (!%p236_p9), 31744  }
  0x11   : > { %s2526_s26 = sand.u32 (!%p236_p9), 1, %s2302_s22   ;;  %s1845_s15 = sshll.u32 (!%p236_p9), %s2373_s25, 11 }
  0x12   : > { %1898 = vmatprep.subr.bf16.mxu0 (!%p236_p9), %v320_v2  ;;  %1998 = vmatprep.subr.bf16.mxu1 (!%p236_p9), %v320_v2  ;;  %s1775_s28 = sshll.u32 (!%p236_p9), %s2526_s26, 7  ;;  %s2896_s19 = scalar_lea.hbm (!%p236_p9), %s3028_s5, %s1845_s15 }
  0x13   : > { %1899 = vmatpush3.bf16.msra.mxu0 (!%p236_p9), %v320_v2  ;;  %1999 = vmatpush3.bf16.msra.mxu1 (!%p236_p9), %v320_v2  ;;  %s2540_s29 = scalar_lea.vmem (!%p236_p9), [#allocation4], %s1775_s28  ;;  %s2314_s9 = smov (!%p236_p9), [#allocation2]  }
  0x14   : > { %s2220_s10 = sshll.u32 (!%p236_p9), %s2314_s9, 4  ;;  %s2221_s10 = int_to_ptr.vmem [resolvable:$false] %s2220_s10 }
  0x15   : > { %s2222_s11 = scalar_lea.vmem (!%p236_p9), %s2221_s10, 4096 }
  0x17   : > { %s3037_s13 = smov (!%p278_p10, %s1777_s13), 7 }
  0x18   : > { %s1842_s14 = sshll.u32 %s3037_s13, 5  ;;  %s2724_s13 = scalar_lea.vmem [#allocation2], %s1775_s28 }
  0x19   : > { %s282_s17 = scalar_lea.vmem %s3023_s0, %s1842_s14  ;;  %s2428_s20 = scalar_lea.vmem %s3024_s1, %s1842_s14 }
  0x1a   : > { %v294_v3 = vld [vmem:[%s282_s17] sm:$0xff]  ;;  %v295_v4 = vld [vmem:[%s282_s17 + $0x8] sm:$0xff]  ;;  %v296_v5 = vld [vmem:[%s282_s17 + $0x10] sm:$0xff]  ;;  %s2313_s14 = smov 8   ;;  %s1648_s16 = sshll.u32 %s2724_s13, 4  ;;  %s2898_s16 = int_to_ptr.vmem [resolvable:$true] %s1648_s16 }
  0x1b   : > { %v310_v6 = vpack.c.bf16 %v295_v4, %v294_v3  ;;  %v297_v7 = vld [vmem:[%s282_s17 + $0x18] sm:$0xff]  ;;  %v298_v8 = vld [vmem:[%s282_s17 + $0x20] sm:$0xff]  ;;  %v299_v9 = vld [vmem:[%s282_s17 + $0x28] sm:$0xff]  ;;  %s2216_s28 = scalar_lea.vmem %s2898_s16, 2048  ;;  %p2223_p0 = scmp.lt.s32.totalorder %s2898_s16, %s2221_s10 }
  0x1c   : > { %v311_v10 = vpack.c.bf16 %v297_v7, %v296_v5  ;;  %v312_v11 = vpack.c.bf16 %v299_v9, %v298_v8  ;;  %v302_v12 = vld [vmem:[%s282_s17 + $0x40] sm:$0xff]  ;;  %v303_v13 = vld [vmem:[%s282_s17 + $0x48] sm:$0xff]  ;;  %v304_v14 = vld [vmem:[%s282_s17 + $0x50] sm:$0xff]  ;;  %p2217_p11 = scmp.ne.s32.totalorder %s2898_s16, %s2216_s28  ;;  %p2224_p1 = scmp.lt.s32.totalorder %s2222_s11, %s2216_s28 }
  0x1d   : > { %1900 = vmatprep.mubr.msk.bf16.mxu0 %vm321_vm0, %v310_v6  ;;  %v305_v15 = vld [vmem:[%s282_s17 + $0x58] sm:$0xff]  ;;  %v314_v16 = vpack.c.bf16 %v303_v13, %v302_v12  ;;  %v306_v18 = vld [vmem:[%s282_s17 + $0x60] sm:$0xff]  ;;  %v307_v19 = vld [vmem:[%s282_s17 + $0x68] sm:$0xff] }
  0x1e   : > { %1901 = vmatmul.mubr.msk.bf16.vlgmr.msra.gmra.mrb[0].mxu0 %vm321_vm0, %v311_v10  ;;  %v315_v17 = vpack.c.bf16 %v305_v15, %v304_v14  ;;  %v300_v20 = vld [vmem:[%s282_s17 + $0x30] sm:$0xff]  ;;  %v301_v21 = vld [vmem:[%s282_s17 + $0x38] sm:$0xff]  ;;  %v316_v22 = vpack.c.bf16 %v307_v19, %v306_v18  ;;  %v451_v27 = vld [vmem:[%s2428_s20] sm:$0xff]  ;;  %p2218_p12 = pnand %p2217_p11, %p2390_p5  ;;  %p2225_p2 = por %p2224_p1, %p2223_p0 }
  0x1f   : > { %1904 = vmatprep.mubr.msk.bf16.mxu0 %vm321_vm0, %v312_v11  ;;  %1908 = vmatprep.mubr.msk.bf16.mxu1 %vm321_vm0, %v314_v16  ;;  %v313_v23 = vpack.c.bf16 %v301_v21, %v300_v20  ;;  %v308_v24 = vld [vmem:[%s282_s17 + $0x70] sm:$0xff]  ;;  %v309_v25 = vld [vmem:[%s282_s17 + $0x78] sm:$0xff]  ;;  %v452_v28 = vld [vmem:[%s2428_s20 + $0x8] sm:$0xff] }
  0x20   : > { %1909 = vmatmul.mubr.msk.bf16.vlgmr.msra.gmra.mrb[0].mxu1 %vm321_vm0, %v315_v17  ;;  %v317_v26 = vpack.c.bf16 %v309_v25, %v308_v24  ;;  %v467_v29 = vpack.c.bf16 %v452_v28, %v451_v27  ;;  %v453_v41 = vld [vmem:[%s2428_s20 + $0x10] sm:$0xff]  ;;  %v454_v42 = vld [vmem:[%s2428_s20 + $0x18] sm:$0xff]  ;;  %v455_v45 = vld [vmem:[%s2428_s20 + $0x20] sm:$0xff]  ;;  %p2219_p13 = pneg %p2218_p12 }
  0x21   : > { %1912 = vmatprep.mubr.msk.bf16.mxu1 %vm321_vm0, %v316_v22  ;;  %v456_v46 = vld [vmem:[%s2428_s20 + $0x28] sm:$0xff]  ;;  %v468_v49 = vpack.c.bf16 %v454_v42, %v453_v41  ;;  %v457_v59 = vld [vmem:[%s2428_s20 + $0x30] sm:$0xff]  ;;  %v458_v60 = vld [vmem:[%s2428_s20 + $0x38] sm:$0xff] }
  0x22   : > { %v469_v52 = vpack.c.bf16 %v456_v46, %v455_v45  ;;  %v459_v62 = vld [vmem:[%s2428_s20 + $0x40] sm:$0xff]  ;;  %v460_v63 = vld [vmem:[%s2428_s20 + $0x48] sm:$0xff]  ;;  %v470_v0 = vpack.c.bf16 %v458_v60, %v457_v59  ;;  %v461_v2 = vld [vmem:[%s2428_s20 + $0x50] sm:$0xff]  ;;  %p2226_p3 = pnand %p2225_p2, %p2219_p13 }
  0x23   : > { %v471_v1 = vpack.c.bf16 %v460_v63, %v459_v62  ;;  %v462_v3 = vld [vmem:[%s2428_s20 + $0x58] sm:$0xff]  ;;  %v463_v4 = vld [vmem:[%s2428_s20 + $0x60] sm:$0xff]  ;;  %v464_v5 = vld [vmem:[%s2428_s20 + $0x68] sm:$0xff] }
  0x24   : > { %v472_v6 = vpack.c.bf16 %v462_v3, %v461_v2  ;;  %v473_v7 = vpack.c.bf16 %v464_v5, %v463_v4  ;;  %v465_v8 = vld [vmem:[%s2428_s20 + $0x70] sm:$0xff]  ;;  %v466_v9 = vld [vmem:[%s2428_s20 + $0x78] sm:$0xff]  ;;  %s1629_s20 = scalar_lea.sflag [#allocation3], %s2526_s26 }
  0x25   : > { %v474_v10 = vpack.c.bf16 %v466_v9, %v465_v8 }
  0x26   : > { %1905 = vmatmul.mubr.msk.bf16.gmra.mrb[4].mxu0 %vm321_vm0, %v313_v23 }
  0x28   : > { %1913 = vmatmul.mubr.msk.bf16.gmra.mrb[4].mxu1 %vm321_vm0, %v317_v26 }
  0x29   : > { %1920 = vmatprep.mubr.msk.bf16.mxu1 %vm475_vm1, %v467_v29 }
  0xf1   : > { %v1902_v30 = vpop.f32.mrb[0].mxu0 }
  0xf2   : > { %v380_v31 = vpop.f32.mrb[1].mxu0 }
  0xf3   : > { %v1903_v32 = vpop.f32.mrb[2].mxu0  ;;  %v1910_v35 = vpop.f32.mrb[0].mxu1 }
  0xf4   : > { %v444_v33 = vpack.c.bf16 %v1903_v32, %v1902_v30  ;;  %v383_v34 = vpop.f32.mrb[3].mxu0  ;;  %v412_v37 = vpop.f32.mrb[1].mxu1 }
  0xf5   : > { %v443_v36 = vpack.c.bf16 %v383_v34, %v380_v31  ;;  %v1911_v38 = vpop.f32.mrb[2].mxu1 }
  0xf6   : > { %v448_v39 = vpack.c.bf16 %v1911_v38, %v1910_v35  ;;  %v415_v40 = vpop.f32.mrb[3].mxu1 }
  0xf7   : > { %1916 = vmatprep.subr.bf16.mxu1 %v443_v36  ;;  %v447_v43 = vpack.c.bf16 %v415_v40, %v412_v37 }
  0xf8   : > { %1917 = vmatpush3.bf16.msra.mxu1 %v443_v36 }
  0xf9   : > { %v1906_v44 = vpop.f32.mrb[4].mxu0  ;;  %1918 = vmatprep.subr.bf16.mxu1 %v444_v33 }
  0xfa   : > { %v396_v47 = vpop.f32.mrb[5].mxu0 }
  0xfb   : > { %v1907_v48 = vpop.f32.mrb[6].mxu0  ;;  %v1914_v53 = vpop.f32.mrb[4].mxu1 }
  0xfc   : > { %v446_v50 = vpack.c.bf16 %v1907_v48, %v1906_v44  ;;  %v399_v51 = vpop.f32.mrb[7].mxu0  ;;  %1919 = vmatpush3.bf16.msra.mxu1 %v444_v33  ;;  %v428_v55 = vpop.f32.mrb[5].mxu1 }
  0xfd   : > { %v445_v54 = vpack.c.bf16 %v399_v51, %v396_v47  ;;  %v1915_v56 = vpop.f32.mrb[6].mxu1 }
  0xfe   : > { %v450_v57 = vpack.c.bf16 %v1915_v56, %v1914_v53  ;;  %v431_v58 = vpop.f32.mrb[7].mxu1 }
  0xff   : > { %1921 = vmatmul.mubr.msk.bf16.vlgmr.msra.gmra.mrb[8].mxu1 %vm475_vm1, %v468_v49  ;;  %1924 = vmatprep.subr.bf16.mxu1 %v445_v54  ;;  %v449_v61 = vpack.c.bf16 %v431_v58, %v428_v55 }
 0x100   : > { %1925 = vmatpush3.bf16.msra.mxu1 %v445_v54  ;;  %1928 = vmatprep.mubr.msk.bf16.mxu1 %vm475_vm1, %v469_v52 }
 0x101   : > { %1926 = vmatprep.subr.bf16.mxu1 %v446_v50 }
 0x104   : > { %1927 = vmatpush3.bf16.msra.mxu1 %v446_v50 }
 0x105   : > { %1932 = vmatprep.subr.bf16.mxu1 %v447_v43 }
 0x107   : > { %1929 = vmatmul.mubr.msk.bf16.vlgmr.msra.gmra.mrb[12].mxu1 %vm475_vm1, %v470_v0 }
 0x108   : > { %1933 = vmatpush3.bf16.msra.mxu1 %v447_v43  ;;  %1936 = vmatprep.mubr.msk.bf16.mxu1 %vm475_vm1, %v471_v1 }
 0x109   : > { %1934 = vmatprep.subr.bf16.mxu1 %v448_v39 }
 0x10c   : > { %1935 = vmatpush3.bf16.msra.mxu1 %v448_v39 }
 0x10d   : > { %1940 = vmatprep.subr.bf16.mxu1 %v449_v61 }
 0x10f   : > { %1937 = vmatmul.mubr.msk.bf16.vlgmr.msra.gmra.mrb[16].mxu1 %vm475_vm1, %v472_v6 }
 0x110   : > { %1941 = vmatpush3.bf16.msra.mxu1 %v449_v61  ;;  %1944 = vmatprep.mubr.msk.bf16.mxu1 %vm475_vm1, %v473_v7 }
 0x111   : > { %1942 = vmatprep.subr.bf16.mxu1 %v450_v57 }
 0x114   : > { %1943 = vmatpush3.bf16.msra.mxu1 %v450_v57 }
 0x117   : > { %1945 = vmatmul.mubr.msk.bf16.vlgmr.msra.gmra.mrb[20].mxu1 %vm475_vm1, %v474_v10 }
 0x1d2   : > { %v1922_v11 = vpop.f32.mrb[8].mxu1 }
 0x1d3   : > { %v698_v12 = vmul.f32 0.01, %v1922_v11  ;;  %v516_v13 = vpop.f32.mrb[9].mxu1 }
 0x1d4   : > { %v696_v14 = vmul.f32 0.01, %v516_v13  ;;  %v1923_v15 = vpop.f32.mrb[10].mxu1 }
 0x1d5   : > { %v2454_v16 = vmax.f32 %v1922_v11, %v698_v12  ;;  %v699_v17 = vmul.f32 0.01, %v1923_v15  ;;  %v519_v18 = vpop.f32.mrb[11].mxu1 }
 0x1d6   : > { %v2456_v19 = vmax.f32 %v516_v13, %v696_v14  ;;  %v697_v20 = vmul.f32 0.01, %v519_v18 }
 0x1d7   : > { %v2458_v21 = vmax.f32 %v1923_v15, %v699_v17  ;;  %v730_v22 = vmul.f32 %v2454_v16, %v2454_v16 }
 0x1d8   : > { %v2462_v23 = vmax.f32 %v519_v18, %v697_v20  ;;  %v728_v24 = vmul.f32 %v2456_v19, %v2456_v19 }
 0x1d9   : > { %v751_v25 = vsel %vm744_vm2, %v730_v22, 0.0  ;;  %v731_v26 = vmul.f32 %v2458_v21, %v2458_v21 }
 0x1da   : > { %752 = vadd.xlane.f32.xlu1 %v751_v25  ;;  %v745_v27 = vsel %vm744_vm2, %v728_v24, 0.0  ;;  %v1930_v28 = vpop.f32.mrb[12].mxu1  ;;  %v729_v29 = vmul.f32 %v2462_v23, %v2462_v23 }
 0x1db   : > { %746 = vadd.xlane.f32.xlu0 %v745_v27  ;;  %v571_v30 = vpop.f32.mrb[13].mxu1  ;;  %v754_v32 = vsel %vm744_vm2, %v731_v26, 0.0  ;;  %v702_v50 = vmul.f32 0.01, %v1930_v28 }
 0x1dc   : > { %v1931_v31 = vpop.f32.mrb[14].mxu1  ;;  %v748_v34 = vsel %vm744_vm2, %v729_v29, 0.0  ;;  %v700_v42 = vmul.f32 0.01, %v571_v30 }
 0x1dd   : > { %v574_v33 = vpop.f32.mrb[15].mxu1  ;;  %v703_v56 = vmul.f32 0.01, %v1931_v31  ;;  %v2496_v0 = vmax.f32 %v1930_v28, %v702_v50 }
 0x1de   : > { %755 = vadd.xlane.f32.xlu1 %v754_v32  ;;  %v701_v46 = vmul.f32 0.01, %v574_v33  ;;  %v2484_v51 = vmax.f32 %v571_v30, %v700_v42 }
 0x1df   : > { %749 = vadd.xlane.f32.xlu0 %v748_v34  ;;  %v2501_v4 = vmax.f32 %v1931_v31, %v703_v56  ;;  %v734_v12 = vmul.f32 %v2496_v0, %v2496_v0  ;;  %v2312_v31 = vmov 0.0  }
 0x1e0   : > { %v2491_v58 = vmax.f32 %v574_v33, %v701_v46  ;;  %v732_v2 = vmul.f32 %v2484_v51, %v2484_v51  ;;  %1517 = vst [vmem:[%s2540_s29 + $0x10] sm:$0xff] %v2312_v31  ;;  %1515 = vst [vmem:[%s2540_s29] sm:$0xff] %v2312_v31 }
 0x1e1   : > { %v735_v15 = vmul.f32 %v2501_v4, %v2501_v4  ;;  %v763_v20 = vsel %vm744_vm2, %v734_v12, 0.0  ;;  %1516 = vst [vmem:[%s2540_s29 + $0x8] sm:$0xff] %v2312_v31  ;;  %1518 = vst [vmem:[%s2540_s29 + $0x18] sm:$0xff] %v2312_v31 }
 0x1e2   : > { %v1938_v35 = vpop.f32.mrb[16].mxu1  ;;  %v733_v8 = vmul.f32 %v2491_v58, %v2491_v58  ;;  %v757_v9 = vsel %vm744_vm2, %v732_v2, 0.0  ;;  %1519 = vst [vmem:[%s2540_s29 + $0x20] sm:$0xff] %v2312_v31  ;;  %1520 = vst [vmem:[%s2540_s29 + $0x28] sm:$0xff] %v2312_v31 }
 0x1e3   : > { %v706_v36 = vmul.f32 0.01, %v1938_v35  ;;  %v626_v37 = vpop.f32.mrb[17].mxu1  ;;  %v766_v24 = vsel %vm744_vm2, %v735_v15, 0.0  ;;  %1521 = vst [vmem:[%s2540_s29 + $0x30] sm:$0xff] %v2312_v31  ;;  %1522 = vst [vmem:[%s2540_s29 + $0x38] sm:$0xff] %v2312_v31 }
 0x1e4   : > { %v704_v38 = vmul.f32 0.01, %v626_v37  ;;  %v1939_v39 = vpop.f32.mrb[18].mxu1  ;;  %v760_v14 = vsel %vm744_vm2, %v733_v8, 0.0  ;;  %1523 = vst [vmem:[%s2540_s29 + $0x40] sm:$0xff] %v2312_v31  ;;  %1524 = vst [vmem:[%s2540_s29 + $0x48] sm:$0xff] %v2312_v31 }
 0x1e5   : > { %v707_v40 = vmul.f32 0.01, %v1939_v39  ;;  %v629_v41 = vpop.f32.mrb[19].mxu1  ;;  %v2474_v43 = vmax.f32 %v1938_v35, %v706_v36  ;;  %1525 = vst [vmem:[%s2540_s29 + $0x50] sm:$0xff] %v2312_v31  ;;  %1526 = vst [vmem:[%s2540_s29 + $0x58] sm:$0xff] %v2312_v31 }
 0x1e6   : > { %v2476_v44 = vmax.f32 %v626_v37, %v704_v38  ;;  %v705_v45 = vmul.f32 0.01, %v629_v41  ;;  %1527 = vst [vmem:[%s2540_s29 + $0x60] sm:$0xff] %v2312_v31  ;;  %1528 = vst [vmem:[%s2540_s29 + $0x68] sm:$0xff] %v2312_v31 }
 0x1e7   : > { %v2478_v47 = vmax.f32 %v1939_v39, %v707_v40  ;;  %v738_v54 = vmul.f32 %v2474_v43, %v2474_v43  ;;  %1529 = vst [vmem:[%s2540_s29 + $0x70] sm:$0xff] %v2312_v31  ;;  %1530 = vst [vmem:[%s2540_s29 + $0x78] sm:$0xff] %v2312_v31 }
 0x1e8   : > { %v2480_v48 = vmax.f32 %v629_v41, %v705_v45  ;;  %v736_v49 = vmul.f32 %v2476_v44, %v2476_v44 }
 0x1e9   : > { %v739_v60 = vmul.f32 %v2478_v47, %v2478_v47  ;;  %v775_v1 = vsel %vm744_vm2, %v738_v54, 0.0 }
 0x1ea   : > { %v769_v52 = vsel %vm744_vm2, %v736_v49, 0.0  ;;  %v737_v53 = vmul.f32 %v2480_v48, %v2480_v48  ;;  %v1946_v55 = vpop.f32.mrb[20].mxu1 }
 0x1eb   : > { %770 = vadd.xlane.f32.xlu0 %v769_v52  ;;  %v681_v57 = vpop.f32.mrb[21].mxu1  ;;  %v778_v5 = vsel %vm744_vm2, %v739_v60, 0.0  ;;  %v710_v6 = vmul.f32 0.01, %v1946_v55 }
 0x1ec   : > { %v772_v59 = vsel %vm744_vm2, %v737_v53, 0.0  ;;  %v708_v61 = vmul.f32 0.01, %v681_v57  ;;  %v1947_v62 = vpop.f32.mrb[22].mxu1 }
 0x1ed   : > { %773 = vadd.xlane.f32.xlu1 %v772_v59  ;;  %v684_v63 = vpop.f32.mrb[23].mxu1  ;;  %v711_v10 = vmul.f32 0.01, %v1947_v62  ;;  %v2513_v13 = vmax.f32 %v1946_v55, %v710_v6 }
 0x1ee   : > { %v709_v3 = vmul.f32 0.01, %v684_v63  ;;  %v2504_v7 = vmax.f32 %v681_v57, %v708_v61 }
 0x1ef   : > { %776 = vadd.xlane.f32.xlu0 %v775_v1  ;;  %v2520_v18 = vmax.f32 %v1947_v62, %v711_v10  ;;  %v742_v26 = vmul.f32 %v2513_v13, %v2513_v13 }
 0x1f0   : > { %v2509_v11 = vmax.f32 %v684_v63, %v709_v3  ;;  %v740_v17 = vmul.f32 %v2504_v7, %v2504_v7 }
 0x1f1   : > { %779 = vadd.xlane.f32.xlu1 %v778_v5  ;;  %v743_v28 = vmul.f32 %v2520_v18, %v2520_v18  ;;  %v787_v29 = vsel %vm744_vm2, %v742_v26, 0.0 }
 0x1f2   : > { %v741_v22 = vmul.f32 %v2509_v11, %v2509_v11  ;;  %v781_v25 = vsel %vm744_vm2, %v740_v17, 0.0 }
 0x1f3   : > { %758 = vadd.xlane.f32.xlu0 %v757_v9  ;;  %v790_v30 = vsel %vm744_vm2, %v743_v28, 0.0 }
 0x1f4   : > { %v784_v27 = vsel %vm744_vm2, %v741_v22, 0.0 }
 0x1f5   : > { %761 = vadd.xlane.f32.xlu1 %v760_v14 }
 0x1f7   : > { %764 = vadd.xlane.f32.xlu0 %v763_v20 }
 0x1f9   : > { %767 = vadd.xlane.f32.xlu1 %v766_v24 }
 0x1fb   : > { %782 = vadd.xlane.f32.xlu0 %v781_v25 }
 0x1fd   : > { %785 = vadd.xlane.f32.xlu1 %v784_v27 }
 0x1ff   : > { %788 = vadd.xlane.f32.xlu0 %v787_v29 }
 0x201   : > { %791 = vadd.xlane.f32.xlu1 %v790_v30 }
 0x267   : > { %v753_v32 = vpop.xlane.xlu1 %752 }
 0x268   : > { %v795_v33 = vmax.f32 %v753_v32, 1e-24  ;;  %v747_v34 = vpop.xlane.xlu0 %746 }
 0x269   : > { %v793_v35 = vmax.f32 %v747_v34, 1e-24 }
 0x26a   : > { %2056 = vrsqrt.f32 %v795_v33 }
 0x26b   : > { %2058 = vrsqrt.f32 %v793_v35  ;;  %v756_v36 = vpop.xlane.xlu1 %755 }
 0x26c   : > { %v796_v37 = vmax.f32 %v756_v36, 1e-24  ;;  %v750_v38 = vpop.xlane.xlu0 %749 }
 0x26d   : > { %v794_v39 = vmax.f32 %v750_v38, 1e-24 }
 0x26e   : > { %2060 = vrsqrt.f32 %v796_v37 }
 0x26f   : > { %2062 = vrsqrt.f32 %v794_v39 }
 0x274   : > { %v2057_v40 = vpop.eup %2056 }
 0x275   : > { %v2059_v41 = vpop.eup %2058  ;;  %v843_v42 = vmul.f32 %v2057_v40, %v753_v32  ;;  %v827_v45 = vmul.f32 %v2057_v40, %v2454_v16 }
 0x276   : > { %v841_v46 = vmul.f32 %v2059_v41, %v747_v34  ;;  %v825_v49 = vmul.f32 %v2059_v41, %v2456_v19 }
 0x277   : > { %v2560_v50 = vmul.f32 %v2057_v40, %v843_v42  ;;  %1533 = vst.msk [vmem:[%s2540_s29 + $0x10] sm:$0xff] %vm744_vm2, %v827_v45 }
 0x278   : > { %v2061_v52 = vpop.eup %2060  ;;  %v2564_v53 = vmul.f32 %v2059_v41, %v841_v46  ;;  %v771_v54 = vpop.xlane.xlu0 %770  ;;  %1531 = vst.msk [vmem:[%s2540_s29] sm:$0xff] %vm744_vm2, %v825_v49 }
 0x279   : > { %v2063_v55 = vpop.eup %2062  ;;  %v844_v56 = vmul.f32 %v2061_v52, %v756_v36  ;;  %v801_v57 = vmax.f32 %v771_v54, 1e-24  ;;  %v828_v16 = vmul.f32 %v2061_v52, %v2458_v21 }
 0x27a   : > { %v842_v59 = vmul.f32 %v2063_v55, %v750_v38  ;;  %v774_v60 = vpop.xlane.xlu1 %773  ;;  %v826_v19 = vmul.f32 %v2063_v55, %v2462_v23 }
 0x27b   : > { %v2570_v61 = vmul.f32 %v2061_v52, %v844_v56  ;;  %2064 = vrsqrt.f32 %v801_v57  ;;  %v802_v62 = vmax.f32 %v774_v60, 1e-24  ;;  %1534 = vst.msk [vmem:[%s2540_s29 + $0x18] sm:$0xff] %vm744_vm2, %v828_v16  ;;  %v2586_v5 = vpack.c.bf16 %v828_v16, %v827_v45 }
 0x27c   : > { %v2574_v63 = vmul.f32 %v2063_v55, %v842_v59  ;;  %v777_v1 = vpop.xlane.xlu0 %776  ;;  %v2576_v2 = vpack.c.bf16 %v826_v19, %v825_v49  ;;  %1532 = vst.msk [vmem:[%s2540_s29 + $0x8] sm:$0xff] %vm744_vm2, %v826_v19 }
 0x27d   : > { %2066 = vrsqrt.f32 %v802_v62  ;;  %v803_v3 = vmax.f32 %v777_v1, 1e-24  ;;  %v885_v24 = vsel %vm744_vm2, %v2586_v5, 0 }
 0x27e   : > { %2000 = vmatprep.subr.msk.bf16.mxu0 %vm744_vm2, %v2576_v2  ;;  %1952 = vmatprep.mubr.msk.bf16.mxu0 %vm744_vm2, %v2576_v2  ;;  %v780_v21 = vpop.xlane.xlu1 %779  ;;  %v882_v23 = vsel %vm744_vm2, %v2576_v2, 0 }
 0x27f   : > { %2068 = vrsqrt.f32 %v803_v3  ;;  %v804_v6 = vmax.f32 %v780_v21, 1e-24  ;;  %1949 = vmatpush3.bf16.xpose.msra.mxu0 %v882_v23 }
 0x280   : > { %2001 = vmatprep.subr.msk.bf16.mxu0 %vm744_vm2, %v2586_v5  ;;  %v759_v8 = vpop.xlane.xlu0 %758 }
 0x281   : > { %2070 = vrsqrt.f32 %v804_v6  ;;  %v797_v9 = vmax.f32 %v759_v8, 1e-24 }
 0x282   : > { %v762_v10 = vpop.xlane.xlu1 %761 }
 0x283   : > { %2072 = vrsqrt.f32 %v797_v9  ;;  %v798_v12 = vmax.f32 %v762_v10, 1e-24 }
 0x284   : > { %v765_v14 = vpop.xlane.xlu0 %764 }
 0x285   : > { %v2065_v15 = vpop.eup %2064  ;;  %2074 = vrsqrt.f32 %v798_v12  ;;  %v799_v17 = vmax.f32 %v765_v14, 1e-24 }
 0x286   : > { %v849_v20 = vmul.f32 %v2065_v15, %v771_v54  ;;  %v768_v22 = vpop.xlane.xlu1 %767  ;;  %v833_v25 = vmul.f32 %v2065_v15, %v2476_v44 }
 0x287   : > { %v2067_v26 = vpop.eup %2066  ;;  %2076 = vrsqrt.f32 %v799_v17  ;;  %v800_v27 = vmax.f32 %v768_v22, 1e-24  ;;  %1951 = vmatpush3.bf16.xpose.msra.mxu0 %v885_v24 }
 0x288   : > { %v2593_v28 = vmul.f32 %v2065_v15, %v849_v20  ;;  %v850_v29 = vmul.f32 %v2067_v26, %v774_v60  ;;  %v2595_v30 = vpop.xlane.xlu0 %782  ;;  %v834_v31 = vmul.f32 %v2067_v26, %v2480_v48  ;;  %1539 = vst.msk [vmem:[%s2540_s29 + $0x40] sm:$0xff] %vm744_vm2, %v833_v25 }
 0x289   : > { %v2069_v32 = vpop.eup %2068  ;;  %2078 = vrsqrt.f32 %v800_v27  ;;  %v805_v33 = vmax.f32 %v2595_v30, 1e-24 }
 0x28a   : > { %v2601_v44 = vmul.f32 %v2067_v26, %v850_v29  ;;  %v851_v34 = vmul.f32 %v2069_v32, %v777_v1  ;;  %v786_v35 = vpop.xlane.xlu1 %785  ;;  %v2603_v36 = vpack.c.bf16 %v834_v31, %v833_v25  ;;  %v835_v37 = vmul.f32 %v2069_v32, %v2474_v43  ;;  %1540 = vst.msk [vmem:[%s2540_s29 + $0x48] sm:$0xff] %vm744_vm2, %v834_v31 }
 0x28b   : > { %v2071_v38 = vpop.eup %2070  ;;  %2080 = vrsqrt.f32 %v805_v33  ;;  %v806_v48 = vmax.f32 %v786_v35, 1e-24 }
 0x28c   : > { %v2608_v39 = vmul.f32 %v2069_v32, %v851_v34  ;;  %v852_v40 = vmul.f32 %v2071_v38, %v780_v21  ;;  %2004 = vmatprep.subr.msk.bf16.mxu0 %vm744_vm2, %v2603_v36  ;;  %v2612_v41 = vpop.xlane.xlu0 %788  ;;  %v836_v42 = vmul.f32 %v2071_v38, %v2478_v47  ;;  %1541 = vst.msk [vmem:[%s2540_s29 + $0x50] sm:$0xff] %vm744_vm2, %v835_v37  ;;  %v992_v46 = vsel %vm744_vm2, %v2603_v36, 0 }
 0x28d   : > { %v2073_v45 = vpop.eup %2072  ;;  %2082 = vrsqrt.f32 %v806_v48  ;;  %v807_v43 = vmax.f32 %v2612_v41, 1e-24 }
 0x28e   : > { %v2620_v49 = vmul.f32 %v2071_v38, %v852_v40  ;;  %v845_v52 = vmul.f32 %v2073_v45, %v759_v8  ;;  %1953 = vmatmul.mubr.msk.bf16.vlgmr.msra.gmra.mrb[8].mxu0 %vm744_vm2, %v2586_v5  ;;  %v2624_v54 = vpop.xlane.xlu1 %791  ;;  %v2626_v55 = vpack.c.bf16 %v836_v42, %v835_v37  ;;  %v829_v47 = vmul.f32 %v2073_v45, %v2484_v51  ;;  %v1213_v51 = vld [vmem:[%s3026_s3] sm:$0xf] }
 0x28f   : > { %1542 = vst.msk [vmem:[%s2540_s29 + $0x58] sm:$0xff] %vm744_vm2, %v836_v42  ;;  %v2075_v56 = vpop.eup %2074  ;;  %2084 = vrsqrt.f32 %v807_v43  ;;  %v808_v57 = vmax.f32 %v2624_v54, 1e-24  ;;  %1965 = vmatpush3.bf16.xpose.msra.mxu0 %v992_v46  ;;  %1968 = vmatprep.mubr.msk.bf16.mxu0 %vm744_vm2, %v2603_v36 }
 0x290   : > { %v2634_v16 = vmul.f32 %v2073_v45, %v845_v52  ;;  %v846_v59 = vmul.f32 %v2075_v56, %v762_v10  ;;  %2005 = vmatprep.subr.msk.bf16.mxu0 %vm744_vm2, %v2626_v55  ;;  %v830_v60 = vmul.f32 %v2075_v56, %v2491_v58  ;;  %1535 = vst.msk [vmem:[%s2540_s29 + $0x20] sm:$0xff] %vm744_vm2, %v829_v47  ;;  %v995_v12 = vsel %vm744_vm2, %v2626_v55, 0 }
 0x291   : > { %v2077_v19 = vpop.eup %2076  ;;  %2086 = vrsqrt.f32 %v808_v57  ;;  %v1214_v58 = vpack.c.bf16 %v1213_v51, %v1213_v51 }
 0x292   : > { %v2644_v62 = vmul.f32 %v2075_v56, %v846_v59  ;;  %v847_v1 = vmul.f32 %v2077_v19, %v765_v14  ;;  %v875_v3 = vpack.c.bf16 %v830_v60, %v829_v47  ;;  %v831_v21 = vmul.f32 %v2077_v19, %v2496_v0  ;;  %1536 = vst.msk [vmem:[%s2540_s29 + $0x28] sm:$0xff] %vm744_vm2, %v830_v60 }
 0x293   : > { %v2079_v23 = vpop.eup %2078 }
 0x294   : > { %v2649_v6 = vmul.f32 %v2077_v19, %v847_v1  ;;  %v848_v8 = vmul.f32 %v2079_v23, %v768_v22  ;;  %2002 = vmatprep.subr.msk.bf16.mxu1 %vm744_vm2, %v875_v3  ;;  %1960 = vmatprep.mubr.msk.bf16.mxu1 %vm744_vm2, %v875_v3  ;;  %v937_v9 = vsel %vm744_vm2, %v875_v3, 0  ;;  %v832_v10 = vmul.f32 %v2079_v23, %v2501_v4 }
 0x295   : > { %1537 = vst.msk [vmem:[%s2540_s29 + $0x30] sm:$0xff] %vm744_vm2, %v831_v21  ;;  %v2081_v0 = vpop.eup %2080  ;;  %1957 = vmatpush3.bf16.xpose.msra.mxu1 %v937_v9 }
 0x296   : > { %v2659_v14 = vmul.f32 %v2079_v23, %v848_v8  ;;  %v853_v15 = vmul.f32 %v2081_v0, %v2595_v30  ;;  %v876_v17 = vpack.c.bf16 %v832_v10, %v831_v21  ;;  %v837_v20 = vmul.f32 %v2081_v0, %v2504_v7  ;;  %1538 = vst.msk [vmem:[%s2540_s29 + $0x38] sm:$0xff] %vm744_vm2, %v832_v10  ;;  %v2714_v21 = vld [vmem:[%s3027_s4] ss:$0 sm:$0xff] }
 0x297   : > { %v2083_v22 = vpop.eup %2082  ;;  %1967 = vmatpush3.bf16.xpose.msra.mxu0 %v995_v12  ;;  %v1324_v12 = vadd.f32 %v2714_v21, %v2560_v50 }
 0x298   : > { %v2665_v4 = vmul.f32 %v2081_v0, %v853_v15  ;;  %v854_v24 = vmul.f32 %v2083_v22, %v786_v35  ;;  %2003 = vmatprep.subr.msk.bf16.mxu1 %vm744_vm2, %v876_v17  ;;  %v838_v25 = vmul.f32 %v2083_v22, %v2509_v11  ;;  %2008 = vmatprep.subr.msk.bf16.mxu0 %vm744_vm2, %v1214_v58  ;;  %v940_v30 = vsel %vm744_vm2, %v876_v17, 0 }
 0x299   : > { %1543 = vst.msk [vmem:[%s2540_s29 + $0x60] sm:$0xff] %vm744_vm2, %v837_v20  ;;  %v2672_v26 = vpop.eup %2084  ;;  %v1216_v11 = vsel %vm744_vm2, %v1214_v58, 0 }
 0x29a   : > { %v2674_v7 = vmul.f32 %v2083_v22, %v854_v24  ;;  %v839_v27 = vmul.f32 %v2672_v26, %v2513_v13  ;;  %1544 = vst.msk [vmem:[%s2540_s29 + $0x68] sm:$0xff] %vm744_vm2, %v838_v25  ;;  %v879_v31 = vpack.c.bf16 %v838_v25, %v837_v20  ;;  %v1322_v24 = vadd.f32 %v2714_v21, %v2564_v53 }
 0x29b   : > { %v2680_v29 = vpop.eup %2086 }
 0x29c   : > { %v840_v32 = vmul.f32 %v2680_v29, %v2520_v18  ;;  %1545 = vst.msk [vmem:[%s2540_s29 + $0x70] sm:$0xff] %vm744_vm2, %v839_v27  ;;  %v1047_v13 = vsel %vm744_vm2, %v879_v31, 0 }
 0x29d   : > { %1959 = vmatpush3.bf16.xpose.msra.mxu1 %v940_v30 }
 0x29e   : > { %1969 = vmatmul.mubr.msk.bf16.vlgmr.msra.gmra.mrb[12].mxu0 %vm744_vm2, %v2626_v55  ;;  %2006 = vmatprep.subr.msk.bf16.mxu1 %vm744_vm2, %v879_v31  ;;  %1546 = vst.msk [vmem:[%s2540_s29 + $0x78] sm:$0xff] %vm744_vm2, %v840_v32  ;;  %v880_v33 = vpack.c.bf16 %v840_v32, %v839_v27 }
 0x29f   : > { %1981 = vmatpush3.bf16.xpose.msra.mxu0 %v1216_v11  ;;  %1982 = vmatprep.mubr.msk.bf16.mxu0 %vm744_vm2, %v2576_v2  ;;  %v1325_v11 = vadd.f32 %v2714_v21, %v2570_v61  ;;  %v855_v61 = vmul.f32 %v2672_v26, %v2612_v41 }
 0x2a0   : > { %v1050_v18 = vsel %vm744_vm2, %v880_v33, 0 }
 0x2a4   : > { %1961 = vmatmul.mubr.msk.bf16.vlgmr.msra.gmra.mrb[24].mxu1 %vm744_vm2, %v876_v17 }
 0x2a5   : > { %1973 = vmatpush3.bf16.xpose.msra.mxu1 %v1047_v13  ;;  %1976 = vmatprep.mubr.msk.bf16.mxu1 %vm744_vm2, %v879_v31 }
 0x2a6   : > { %2007 = vmatprep.subr.msk.bf16.mxu1 %vm744_vm2, %v880_v33  ;;  %1983 = vmatmul.mubr.msk.bf16.vlgmr.msra.gmra.mrb[16].mxu0 %vm744_vm2, %v2586_v5 }
 0x2a7   : > { %1986 = vmatprep.mubr.msk.bf16.mxu0 %vm744_vm2, %v875_v3 }
 0x2ad   : > { %1975 = vmatpush3.bf16.xpose.msra.mxu1 %v1050_v18 }
 0x2ae   : > { %1987 = vmatmul.mubr.msk.bf16.gmra.mrb[20].mxu0 %vm744_vm2, %v876_v17 }
 0x2af   : > { %1990 = vmatprep.mubr.msk.bf16.mxu0 %vm744_vm2, %v2603_v36 }
 0x2b4   : > { %1977 = vmatmul.mubr.msk.bf16.vlgmr.msra.gmra.mrb[28].mxu1 %vm744_vm2, %v880_v33 }
 0x2b6   : > { %1991 = vmatmul.mubr.msk.bf16.gmra.mrb[24].mxu0 %vm744_vm2, %v2626_v55 }
 0x2b7   : > { %1994 = vmatprep.mubr.msk.bf16.mxu0 %vm744_vm2, %v879_v31 }
 0x2be   : > { %1995 = vmatmul.mubr.msk.bf16.gmra.mrb[28].mxu0 %vm744_vm2, %v880_v33  ;;  %v1323_v33 = vadd.f32 %v2714_v21, %v2574_v63  ;;  %v2742_v63 = vadd.f32 %v2714_v21, %v2601_v44  ;;  %v1329_v44 = vadd.f32 %v2714_v21, %v2659_v14 }
 0x361   : > { %v1954_v2 = vpop.f32.mrb[8].mxu0 }
 0x362   : > { %v1809_v5 = vmul.f32 -1.442695, %v1954_v2  ;;  %v921_v34 = vpop.f32.mrb[9].mxu0 }
 0x363   : > { %v1807_v35 = vmul.f32 -1.442695, %v921_v34  ;;  %v1955_v37 = vpop.f32.mrb[10].mxu0 }
 0x364   : > { %2088 = vpow2.f32 %v1809_v5  ;;  %v1810_v38 = vmul.f32 -1.442695, %v1955_v37  ;;  %v924_v48 = vpop.f32.mrb[11].mxu0 }
 0x365   : > { %2090 = vpow2.f32 %v1807_v35  ;;  %v1808_v40 = vmul.f32 -1.442695, %v924_v48 }
 0x366   : > { %2092 = vpow2.f32 %v1810_v38  ;;  %v2738_v38 = vadd.f32 %v2714_v21, %v2593_v28  ;;  %v1328_v28 = vadd.f32 %v2714_v21, %v2649_v6 }
 0x367   : > { %2094 = vpow2.f32 %v1808_v40 }
 0x36e   : > { %v2089_v36 = vpop.eup %2088 }
 0x36f   : > { %v2091_v42 = vpop.eup %2090  ;;  %v1151_v45 = vadd.f32 1.0, %v2089_v36  ;;  %v1326_v36 = vadd.f32 %v2714_v21, %v2634_v16  ;;  %v856_v16 = vmul.f32 %v2680_v29, %v2624_v54 }
 0x370   : > { %v2093_v43 = vpop.eup %2092  ;;  %v1149_v46 = vadd.f32 1.0, %v2091_v42  ;;  %v2750_v42 = vadd.f32 %v2714_v21, %v2608_v39 }
 0x371   : > { %v2095_v52 = vpop.eup %2094  ;;  %2096 = vrcp.f32 %v1151_v45  ;;  %v1152_v55 = vadd.f32 1.0, %v2093_v43  ;;  %v1970_v47 = vpop.f32.mrb[12].mxu0 }
 0x372   : > { %2098 = vrcp.f32 %v1149_v46  ;;  %v1150_v56 = vadd.f32 1.0, %v2095_v52  ;;  %v1817_v57 = vmul.f32 -1.442695, %v1970_v47  ;;  %v1031_v59 = vpop.f32.mrb[13].mxu0  ;;  %v1327_v46 = vadd.f32 %v2714_v21, %v2644_v62 }
 0x373   : > { %2100 = vrcp.f32 %v1152_v55  ;;  %v1815_v60 = vmul.f32 -1.442695, %v1031_v59  ;;  %v1971_v51 = vpop.f32.mrb[14].mxu0  ;;  %v871_v55 = vmul.f32 %v2672_v26, %v855_v61  ;;  %v1333_v61 = vadd.f32 %v2714_v21, %v2620_v49 }
 0x374   : > { %2102 = vrcp.f32 %v1150_v56  ;;  %v1818_v19 = vmul.f32 -1.442695, %v1971_v51  ;;  %v1034_v1 = vpop.f32.mrb[15].mxu0 }
 0x375   : > { %2104 = vpow2.f32 %v1817_v57  ;;  %v1816_v3 = vmul.f32 -1.442695, %v1034_v1 }
 0x376   : > { %2106 = vpow2.f32 %v1815_v60 }
 0x377   : > { %2108 = vpow2.f32 %v1818_v19  ;;  %v1962_v23 = vpop.f32.mrb[24].mxu1 }
 0x378   : > { %2110 = vpow2.f32 %v1816_v3  ;;  %v1813_v58 = vmul.f32 -1.442695, %v1962_v23  ;;  %v976_v8 = vpop.f32.mrb[25].mxu1 }
 0x379   : > { %v1811_v9 = vmul.f32 -1.442695, %v976_v8  ;;  %v1963_v10 = vpop.f32.mrb[26].mxu1  ;;  %v1984_v0 = vpop.f32.mrb[16].mxu0 }
 0x37a   : > { %2112 = vpow2.f32 %v1813_v58  ;;  %v1814_v15 = vmul.f32 -1.442695, %v1963_v10  ;;  %v1340_v17 = vmul.f32 2.0, %v1984_v0  ;;  %v979_v20 = vpop.f32.mrb[27].mxu1  ;;  %v1252_v22 = vpop.f32.mrb[17].mxu0 }
 0x37b   : > { %v2097_v25 = vpop.eup %2096  ;;  %2114 = vpow2.f32 %v1811_v9  ;;  %v1812_v27 = vmul.f32 -1.442695, %v979_v20  ;;  %v1338_v30 = vmul.f32 2.0, %v1252_v22  ;;  %v1985_v31 = vpop.f32.mrb[18].mxu0 }
 0x37c   : > { %v2099_v32 = vpop.eup %2098  ;;  %1199 = vst.msk [vmem:[%s2724_s13 + $0x10] sm:$0xff] %vm475_vm1, %v2097_v25  ;;  %2116 = vpow2.f32 %v1814_v15  ;;  %v1356_v50 = vsub.f32 %v1324_v12, %v1340_v17  ;;  %v1341_v53 = vmul.f32 2.0, %v1985_v31  ;;  %v1255_v13 = vpop.f32.mrb[19].mxu0 }
 0x37d   : > { %v2101_v18 = vpop.eup %2100  ;;  %1197 = vst.msk [vmem:[%s2724_s13] sm:$0xff] %vm475_vm1, %v2099_v32  ;;  %2118 = vpow2.f32 %v1812_v27  ;;  %v1354_v2 = vsub.f32 %v1322_v24, %v1338_v30  ;;  %v1339_v5 = vmul.f32 2.0, %v1255_v13 }
 0x37e   : > { %v2103_v34 = vpop.eup %2102  ;;  %1200 = vst.msk [vmem:[%s2724_s13 + $0x18] sm:$0xff] %vm475_vm1, %v2101_v18  ;;  %v1372_v35 = vmax.f32 %v1356_v50, 0.0  ;;  %v1357_v37 = vsub.f32 %v1325_v11, %v1341_v53 }
 0x37f   : > { %v2105_v48 = vpop.eup %2104  ;;  %1198 = vst.msk [vmem:[%s2724_s13 + $0x8] sm:$0xff] %vm475_vm1, %v2103_v34  ;;  %v1370_v41 = vmax.f32 %v1354_v2, 0.0  ;;  %v1355_v40 = vsub.f32 %v1323_v33, %v1339_v5  ;;  %v872_v2 = vmul.f32 %v2680_v29, %v856_v16 }
 0x380   : > { %v2107_v45 = vpop.eup %2106  ;;  %v1159_v43 = vadd.f32 1.0, %v2105_v48  ;;  %v1388_v39 = vadd.f32 1.0, %v1372_v35  ;;  %v1373_v60 = vmax.f32 %v1357_v37, 0.0  ;;  %v2766_v35 = vadd.f32 %v2714_v21, %v2665_v4 }
 0x381   : > { %v2109_v52 = vpop.eup %2108  ;;  %v1157_v47 = vadd.f32 1.0, %v2107_v45  ;;  %v1988_v56 = vpop.f32.mrb[20].mxu0  ;;  %v1386_v19 = vadd.f32 1.0, %v1370_v41  ;;  %v1371_v26 = vmax.f32 %v1355_v40, 0.0  ;;  %v2769_v40 = vadd.f32 %v2714_v21, %v871_v55 }
 0x382   : > { %v2111_v57 = vpop.eup %2110  ;;  %2120 = vrcp.f32 %v1159_v43  ;;  %v1160_v59 = vadd.f32 1.0, %v2109_v52  ;;  %v1344_v6 = vmul.f32 2.0, %v1988_v56  ;;  %v1268_v51 = vpop.f32.mrb[21].mxu0  ;;  %v1389_v11 = vadd.f32 1.0, %v1373_v60 }
 0x383   : > { %2122 = vrcp.f32 %v1157_v47  ;;  %v1158_v14 = vadd.f32 1.0, %v2111_v57  ;;  %v1342_v1 = vmul.f32 2.0, %v1268_v51  ;;  %v1989_v62 = vpop.f32.mrb[22].mxu0  ;;  %v1387_v53 = vadd.f32 1.0, %v1371_v26 }
 0x384   : > { %v2113_v3 = vpop.eup %2112  ;;  %2124 = vrcp.f32 %v1160_v59  ;;  %v1360_v23 = vsub.f32 %v1328_v28, %v1344_v6  ;;  %v1345_v58 = vmul.f32 2.0, %v1989_v62  ;;  %v1271_v54 = vpop.f32.mrb[23].mxu0 }
 0x385   : > { %v2115_v8 = vpop.eup %2114  ;;  %2126 = vrcp.f32 %v1158_v14  ;;  %v1155_v9 = vadd.f32 1.0, %v2113_v3  ;;  %v1358_v10 = vsub.f32 %v1326_v36, %v1342_v1  ;;  %v1343_v0 = vmul.f32 2.0, %v1271_v54 }
 0x386   : > { %v2117_v12 = vpop.eup %2116  ;;  %v1153_v15 = vadd.f32 1.0, %v2115_v8  ;;  %2128 = vrcp.f32 %v1388_v39  ;;  %v1376_v17 = vmax.f32 %v1360_v23, 0.0  ;;  %v1361_v20 = vsub.f32 %v1329_v44, %v1345_v58 }
 0x387   : > { %v2119_v22 = vpop.eup %2118  ;;  %2130 = vrcp.f32 %v1155_v9  ;;  %v1156_v24 = vadd.f32 1.0, %v2117_v12  ;;  %v1374_v25 = vmax.f32 %v1358_v10, 0.0  ;;  %v1359_v27 = vsub.f32 %v1327_v46, %v1343_v0  ;;  %v1978_v30 = vpop.f32.mrb[28].mxu1 }
 0x388   : > { %2132 = vrcp.f32 %v1153_v15  ;;  %v1154_v31 = vadd.f32 1.0, %v2119_v22  ;;  %v1377_v32 = vmax.f32 %v1361_v20, 0.0  ;;  %v1086_v50 = vpop.f32.mrb[29].mxu1  ;;  %v1392_v5 = vadd.f32 1.0, %v1376_v17 }
 0x389   : > { %2134 = vrcp.f32 %v1156_v24  ;;  %v1375_v13 = vmax.f32 %v1359_v27, 0.0  ;;  %v1979_v33 = vpop.f32.mrb[30].mxu1  ;;  %v1992_v18 = vpop.f32.mrb[24].mxu0  ;;  %v1390_v37 = vadd.f32 1.0, %v1374_v25  ;;  %v1821_v55 = vmul.f32 -1.442695, %v1978_v30 }
 0x38a   : > { %2136 = vrcp.f32 %v1154_v31  ;;  %v1089_v34 = vpop.f32.mrb[31].mxu1  ;;  %v1348_v48 = vmul.f32 2.0, %v1992_v18  ;;  %v1284_v41 = vpop.f32.mrb[25].mxu0  ;;  %v1393_v49 = vadd.f32 1.0, %v1377_v32  ;;  %v1819_v56 = vmul.f32 -1.442695, %v1086_v50 }
 0x38b   : > { %2138 = vrcp.f32 %v1386_v19  ;;  %v1346_v29 = vmul.f32 2.0, %v1284_v41  ;;  %v1993_v45 = vpop.f32.mrb[26].mxu0  ;;  %v1391_v4 = vadd.f32 1.0, %v1375_v13  ;;  %v1822_v60 = vmul.f32 -1.442695, %v1979_v33 }
 0x38c   : > { %v2121_v36 = vpop.eup %2120  ;;  %2140 = vrcp.f32 %v1389_v11  ;;  %v1364_v28 = vsub.f32 %v2750_v42, %v1348_v48  ;;  %v1349_v44 = vmul.f32 2.0, %v1993_v45  ;;  %v1287_v46 = vpop.f32.mrb[27].mxu0  ;;  %v1820_v26 = vmul.f32 -1.442695, %v1089_v34 }
 0x38d   : > { %v2123_v43 = vpop.eup %2122  ;;  %1207 = vst.msk [vmem:[%s2724_s13 + $0x50] sm:$0xff] %vm475_vm1, %v2121_v36  ;;  %2142 = vrcp.f32 %v1387_v53  ;;  %v1362_v16 = vsub.f32 %v2738_v38, %v1346_v29  ;;  %v1347_v47 = vmul.f32 2.0, %v1287_v46  ;;  %v1335_v27 = vadd.f32 %v2714_v21, %v2674_v7 }
 0x38e   : > { %v2125_v52 = vpop.eup %2124  ;;  %1205 = vst.msk [vmem:[%s2724_s13 + $0x40] sm:$0xff] %vm475_vm1, %v2123_v43  ;;  %2144 = vrcp.f32 %v1392_v5  ;;  %v1380_v57 = vmax.f32 %v1364_v28, 0.0  ;;  %v1365_v59 = vsub.f32 %v1333_v61, %v1349_v44 }
 0x38f   : > { %v2127_v39 = vpop.eup %2126  ;;  %1208 = vst.msk [vmem:[%s2724_s13 + $0x58] sm:$0xff] %vm475_vm1, %v2125_v52  ;;  %2146 = vrcp.f32 %v1390_v37  ;;  %v1378_v6 = vmax.f32 %v1362_v16, 0.0  ;;  %v1363_v51 = vsub.f32 %v2742_v63, %v1347_v47  ;;  %v1337_v63 = vadd.f32 %v2714_v21, %v872_v2 }
 0x390   : > { %v2779_v42 = vpop.eup %2128  ;;  %1206 = vst.msk [vmem:[%s2724_s13 + $0x48] sm:$0xff] %vm475_vm1, %v2127_v39  ;;  %2148 = vrcp.f32 %v1393_v49  ;;  %v1396_v14 = vadd.f32 1.0, %v1380_v57  ;;  %v1381_v19 = vmax.f32 %v1365_v59, 0.0 }
 0x391   : > { %v2131_v38 = vpop.eup %2130  ;;  %2150 = vrcp.f32 %v1391_v4  ;;  %v1441_v1 = vsel %vm1434_vm3, %v2779_v42, 0.0  ;;  %v1996_v62 = vpop.f32.mrb[28].mxu0  ;;  %v1394_v8 = vadd.f32 1.0, %v1378_v6  ;;  %v1379_v9 = vmax.f32 %v1363_v51, 0.0 }
 0x392   : > { %v2133_v3 = vpop.eup %2132  ;;  %1203 = vst.msk [vmem:[%s2724_s13 + $0x30] sm:$0xff] %vm475_vm1, %v2131_v38  ;;  %2152 = vpow2.f32 %v1821_v55  ;;  %1442 = vadd.xlane.f32.xlu0 %v1441_v1  ;;  %v1352_v23 = vmul.f32 2.0, %v1996_v62  ;;  %v1300_v58 = vpop.f32.mrb[29].mxu0  ;;  %v1397_v15 = vadd.f32 1.0, %v1381_v19 }
 0x393   : > { %v2135_v54 = vpop.eup %2134  ;;  %1201 = vst.msk [vmem:[%s2724_s13 + $0x20] sm:$0xff] %vm475_vm1, %v2133_v3  ;;  %2154 = vpow2.f32 %v1819_v56  ;;  %v1350_v10 = vmul.f32 2.0, %v1300_v58  ;;  %v1997_v0 = vpop.f32.mrb[30].mxu0  ;;  %v1395_v7 = vadd.f32 1.0, %v1379_v9 }
 0x394   : > { %v2137_v12 = vpop.eup %2136  ;;  %1204 = vst.msk [vmem:[%s2724_s13 + $0x38] sm:$0xff] %vm475_vm1, %v2135_v54  ;;  %2156 = vpow2.f32 %v1822_v60  ;;  %v1368_v17 = vsub.f32 %v2769_v40, %v1352_v23  ;;  %v1353_v20 = vmul.f32 2.0, %v1997_v0  ;;  %v1303_v22 = vpop.f32.mrb[31].mxu0 }
 0x395   : > { %v2794_v24 = vpop.eup %2138  ;;  %1202 = vst.msk [vmem:[%s2724_s13 + $0x28] sm:$0xff] %vm475_vm1, %v2137_v12  ;;  %2158 = vrcp.f32 %v1396_v14  ;;  %v1366_v25 = vsub.f32 %v2766_v35, %v1350_v10  ;;  %v1351_v30 = vmul.f32 2.0, %v1303_v22 }
 0x396   : > { %v2801_v31 = vpop.eup %2140  ;;  %2160 = vpow2.f32 %v1820_v26  ;;  %v1384_v11 = vmax.f32 %v1368_v17, 0.0  ;;  %v1435_v32 = vsel %vm1434_vm3, %v2794_v24, 0.0  ;;  %v1369_v50 = vsub.f32 %v1337_v63, %v1353_v20 }
 0x397   : > { %v2805_v53 = vpop.eup %2142  ;;  %2162 = vrcp.f32 %v1394_v8  ;;  %v1444_v13 = vsel %vm1434_vm3, %v2801_v31, 0.0  ;;  %1436 = vadd.xlane.f32.xlu0 %v1435_v32  ;;  %v1382_v33 = vmax.f32 %v1366_v25, 0.0  ;;  %v1367_v18 = vsub.f32 %v1335_v27, %v1351_v30 }
 0x398   : > { %v2809_v61 = vpop.eup %2144  ;;  %2164 = vrcp.f32 %v1397_v15  ;;  %1445 = vadd.xlane.f32.xlu1 %v1444_v13  ;;  %v1400_v2 = vadd.f32 1.0, %v1384_v11  ;;  %v1438_v41 = vsel %vm1434_vm3, %v2805_v53, 0.0  ;;  %v1385_v28 = vmax.f32 %v1369_v50, 0.0 }
 0x399   : > { %v2811_v21 = vpop.eup %2146  ;;  %v1398_v5 = vadd.f32 1.0, %v1382_v33  ;;  %v1383_v34 = vmax.f32 %v1367_v18, 0.0  ;;  %v1453_v35 = vsel %vm1434_vm3, %v2809_v61, 0.0 }
 0x39a   : > { %v2815_v37 = vpop.eup %2148  ;;  %v1447_v44 = vsel %vm1434_vm3, %v2811_v21, 0.0  ;;  %v1401_v57 = vadd.f32 1.0, %v1385_v28 }
 0x39b   : > { %v2817_v48 = vpop.eup %2150  ;;  %2166 = vrcp.f32 %v1398_v5  ;;  %v1399_v40 = vadd.f32 1.0, %v1383_v34  ;;  %1454 = vadd.xlane.f32.xlu0 %v1453_v35  ;;  %v1456_v45 = vsel %vm1434_vm3, %v2815_v37, 0.0 }
 0x39c   : > { %v2153_v36 = vpop.eup %2152  ;;  %2168 = vrcp.f32 %v1395_v7  ;;  %1439 = vadd.xlane.f32.xlu1 %v1438_v41  ;;  %v1450_v59 = vsel %vm1434_vm3, %v2817_v48, 0.0 }
 0x39d   : > { %v2155_v49 = vpop.eup %2154  ;;  %v1163_v29 = vadd.f32 1.0, %v2153_v36  ;;  %2170 = vrcp.f32 %v1400_v2 }
 0x39e   : > { %v2157_v43 = vpop.eup %2156  ;;  %v1161_v4 = vadd.f32 1.0, %v2155_v49  ;;  %2172 = vrcp.f32 %v1399_v40 }
 0x39f   : > { %v2825_v46 = vpop.eup %2158  ;;  %2174 = vrcp.f32 %v1163_v29  ;;  %v1164_v52 = vadd.f32 1.0, %v2157_v43  ;;  %1448 = vadd.xlane.f32.xlu0 %v1447_v44 }
 0x3a0   : > { %v2161_v55 = vpop.eup %2160  ;;  %2176 = vrcp.f32 %v1161_v4  ;;  %1457 = vadd.xlane.f32.xlu1 %v1456_v45  ;;  %v1465_v16 = vsel %vm1434_vm3, %v2825_v46, 0.0 }
 0x3a1   : > { %v2829_v47 = vpop.eup %2162  ;;  %2178 = vrcp.f32 %v1164_v52  ;;  %v1162_v39 = vadd.f32 1.0, %v2161_v55 }
 0x3a2   : > { %v2831_v56 = vpop.eup %2164  ;;  %v1459_v38 = vsel %vm1434_vm3, %v2829_v47, 0.0 }
 0x3a3   : > { %2180 = vrcp.f32 %v1162_v39  ;;  %1466 = vadd.xlane.f32.xlu0 %v1465_v16  ;;  %v1468_v6 = vsel %vm1434_vm3, %v2831_v56, 0.0 }
 0x3a4   : > { %1451 = vadd.xlane.f32.xlu1 %v1450_v59  ;;  %2182 = vrcp.f32 %v1401_v57 }
 0x3a5   : > { %v2835_v60 = vpop.eup %2166 }
 0x3a6   : > { %v2839_v51 = vpop.eup %2168  ;;  %v1471_v1 = vsel %vm1434_vm3, %v2835_v60, 0.0 }
 0x3a7   : > { %v2843_v14 = vpop.eup %2170  ;;  %1460 = vadd.xlane.f32.xlu0 %v1459_v38  ;;  %v1462_v23 = vsel %vm1434_vm3, %v2839_v51, 0.0 }
 0x3a8   : > { %v2845_v19 = vpop.eup %2172  ;;  %1469 = vadd.xlane.f32.xlu1 %v1468_v6  ;;  %v1477_v54 = vsel %vm1434_vm3, %v2843_v14, 0.0 }
 0x3a9   : > { %v2175_v62 = vpop.eup %2174  ;;  %v1474_v63 = vsel %vm1434_vm3, %v2845_v19, 0.0 }
 0x3aa   : > { %v2177_v3 = vpop.eup %2176  ;;  %1211 = vst.msk [vmem:[%s2724_s13 + $0x70] sm:$0xff] %vm475_vm1, %v2175_v62 }
 0x3ab   : > { %v2179_v26 = vpop.eup %2178  ;;  %1209 = vst.msk [vmem:[%s2724_s13 + $0x60] sm:$0xff] %vm475_vm1, %v2177_v3  ;;  %1472 = vadd.xlane.f32.xlu0 %v1471_v1 }
 0x3ac   : > { %1212 = vst.msk [vmem:[%s2724_s13 + $0x78] sm:$0xff] %vm475_vm1, %v2179_v26  ;;  %1463 = vadd.xlane.f32.xlu1 %v1462_v23 }
 0x3ad   : > { %v2181_v58 = vpop.eup %2180 }
 0x3ae   : > { %1210 = vst.msk [vmem:[%s2724_s13 + $0x68] sm:$0xff] %vm475_vm1, %v2181_v58  ;;  %v2863_v8 = vpop.eup %2182 }
 0x3af   : > { %1478 = vadd.xlane.f32.xlu0 %v1477_v54  ;;  %v1480_v9 = vsel %vm1434_vm3, %v2863_v8, 0.0 }
 0x3b0   : > { %1475 = vadd.xlane.f32.xlu1 %v1474_v63 }
 0x3b4   : > { %1481 = vadd.xlane.f32.xlu1 %v1480_v9 }
 0x41f   : > { %v1443_v10 = vpop.xlane.xlu0 %1442 }
 0x420   : > { %2184 = vrcp.f32 %v1443_v10 }
 0x424   : > { %v1437_v0 = vpop.xlane.xlu0 %1436 }
 0x425   : > { %v1446_v12 = vpop.xlane.xlu1 %1445  ;;  %2186 = vrcp.f32 %v1437_v0 }
 0x426   : > { %2188 = vrcp.f32 %v1446_v12 }
 0x428   : > { %v1455_v15 = vpop.xlane.xlu0 %1454 }
 0x429   : > { %v1440_v17 = vpop.xlane.xlu1 %1439  ;;  %2190 = vrcp.f32 %v1455_v15 }
 0x42a   : > { %v2185_v20 = vpop.eup %2184  ;;  %2192 = vrcp.f32 %v1440_v17 }
 0x42b   : > { %v1488_v22 = vmul.f32 %v2185_v20, %v2779_v42 }
 0x42c   : > { %v1449_v25 = vpop.xlane.xlu0 %1448 }
 0x42d   : > { %v1458_v27 = vpop.xlane.xlu1 %1457  ;;  %2194 = vrcp.f32 %v1449_v25  ;;  %1567 = vrot.lane.b32.xlu1 %v1488_v22, %s2313_s14 }
 0x42e   : > { %2196 = vrcp.f32 %v1458_v27 }
 0x42f   : > { %v2187_v30 = vpop.eup %2186 }
 0x430   : > { %v2189_v11 = vpop.eup %2188  ;;  %v1467_v32 = vpop.xlane.xlu0 %1466  ;;  %v1484_v50 = vmul.f32 %v2187_v30, %v2794_v24 }
 0x431   : > { %v1452_v13 = vpop.xlane.xlu1 %1451  ;;  %2198 = vrcp.f32 %v1467_v32  ;;  %v1490_v33 = vmul.f32 %v2189_v11, %v2801_v31 }
 0x432   : > { %2200 = vrcp.f32 %v1452_v13  ;;  %1563 = vrot.lane.b32.xlu0 %v1484_v50, %s2313_s14 }
 0x433   : > { %v2191_v42 = vpop.eup %2190  ;;  %1569 = vrot.lane.b32.xlu1 %v1490_v33, %s2313_s14 }
 0x434   : > { %v2193_v18 = vpop.eup %2192  ;;  %v1461_v7 = vpop.xlane.xlu0 %1460  ;;  %v1496_v2 = vmul.f32 %v2191_v42, %v2809_v61 }
 0x435   : > { %v1470_v5 = vpop.xlane.xlu1 %1469  ;;  %2202 = vrcp.f32 %v1461_v7  ;;  %v1486_v34 = vmul.f32 %v2193_v18, %v2805_v53 }
 0x436   : > { %2204 = vrcp.f32 %v1470_v5  ;;  %1575 = vrot.lane.b32.xlu0 %v1496_v2, %s2313_s14 }
 0x437   : > { %v2195_v24 = vpop.eup %2194  ;;  %1565 = vrot.lane.b32.xlu1 %v1486_v34, %s2313_s14 }
 0x438   : > { %v2197_v31 = vpop.eup %2196  ;;  %v1473_v35 = vpop.xlane.xlu0 %1472  ;;  %v1492_v41 = vmul.f32 %v2195_v24, %v2811_v21 }
 0x439   : > { %v1464_v40 = vpop.xlane.xlu1 %1463  ;;  %2206 = vrcp.f32 %v1473_v35  ;;  %v1498_v36 = vmul.f32 %v2197_v31, %v2815_v37 }
 0x43a   : > { %2208 = vrcp.f32 %v1464_v40  ;;  %1571 = vrot.lane.b32.xlu0 %v1492_v41, %s2313_s14 }
 0x43b   : > { %v2199_v61 = vpop.eup %2198  ;;  %1577 = vrot.lane.b32.xlu1 %v1498_v36, %s2313_s14 }
 0x43c   : > { %v2201_v53 = vpop.eup %2200  ;;  %v1479_v49 = vpop.xlane.xlu0 %1478  ;;  %v1504_v29 = vmul.f32 %v2199_v61, %v2825_v46 }
 0x43d   : > { %v1476_v45 = vpop.xlane.xlu1 %1475  ;;  %2210 = vrcp.f32 %v1479_v49  ;;  %v1494_v21 = vmul.f32 %v2201_v53, %v2817_v48 }
 0x43e   : > { %2212 = vrcp.f32 %v1476_v45  ;;  %1583 = vrot.lane.b32.xlu0 %v1504_v29, %s2313_s14 }
 0x43f   : > { %v2203_v37 = vpop.eup %2202  ;;  %1573 = vrot.lane.b32.xlu1 %v1494_v21, %s2313_s14 }
 0x440   : > { %v2205_v43 = vpop.eup %2204  ;;  %v1500_v4 = vmul.f32 %v2203_v37, %v2829_v47 }
 0x441   : > { %v1482_v28 = vpop.xlane.xlu1 %1481  ;;  %v1506_v44 = vmul.f32 %v2205_v43, %v2831_v56 }
 0x442   : > { %2214 = vrcp.f32 %v1482_v28  ;;  %1579 = vrot.lane.b32.xlu0 %v1500_v4, %s2313_s14 }
 0x443   : > { %v2207_v48 = vpop.eup %2206  ;;  %1585 = vrot.lane.b32.xlu1 %v1506_v44, %s2313_s14 }
 0x444   : > { %v2209_v46 = vpop.eup %2208  ;;  %v1508_v52 = vmul.f32 %v2207_v48, %v2835_v60 }
 0x445   : > { %v1502_v55 = vmul.f32 %v2209_v46, %v2839_v51 }
 0x446   : > { %2229 = shalt.err (!%p2226_p3)
}
 0x447   : > { %s2230_s12 = scalar_lea.hbm %s2896_s19, 2048  ;;  %s2234_s18 = scalar_lea.hbm %s3028_s5, 4096 }
 0x448   : > { %p2231_p4 = scmp.ne.s32.totalorder %s2896_s19, %s2230_s12  ;;  %p2235_p9 = scmp.lt.u32.totalorder %s2896_s19, %s3028_s5 }
 0x449   : > { %p2236_p10 = scmp.lt.u32.totalorder %s2234_s18, %s2230_s12  ;;  %p2238_p12 = scmp.lt.u32.totalorder %s2230_s12, %s2896_s19 }
 0x44a   : > { %p2232_p7 = pnand %p2231_p4, %p2390_p5 }
 0x44b   : > { %p2237_p11 = por %p2236_p10, %p2235_p9 }
 0x44c   : > { %p2233_p8 = pneg %p2232_p7 }
 0x44d   : > { %p2239_p13 = por %p2238_p12, %p2237_p11 }
 0x44f   : > { %p2240_p0 = pnand %p2239_p13, %p2233_p8 }
 0x451   : > { %2243 = shalt.err (!%p2240_p0)
}
 0x452   : > { %s2315_s28 = smov 128   ;;  %1587 = vrot.lane.b32.xlu0 %v1508_v52, %s2313_s14  ;;  %v2211_v16 = vpop.eup %2210  ;;  %1581 = vrot.lane.b32.xlu1 %v1502_v55, %s2313_s14  ;;  %vm1611_vm4 = vcmask 97344   ;;  %s2973_s11 = scalar_lea.hbm %s3029_s6, %s1845_s15 }
 0x453   : > { %2009 = dma.vmem_to_hbm [thread:$0]  (%p2390_p5), %s2898_s16, 2048, %s2896_s19, %s1629_s20, %s2315_s28, %s2315_s28, %s2313_s14   ;;  %v2213_v47 = vpop.eup %2212  ;;  %v1512_v39 = vmul.f32 %v2211_v16, %v2843_v14 }
 0x454   : > { %v1510_v56 = vmul.f32 %v2213_v47, %v2845_v19  ;;  %v2215_v57 = vpop.eup %2214  ;;  %s1665_s16 = sshll.u32 %s2540_s29, 4  ;;  %s1634_s12 = scalar_lea.sflag [#allocation5], %s2526_s26  ;;  %s2975_s16 = int_to_ptr.vmem [resolvable:$true] %s1665_s16 }
 0x455   : > { %v1514_v59 = vmul.f32 %v2215_v57, %v2863_v8  ;;  %s2244_s13 = scalar_lea.vmem %s2975_s16, 2048  ;;  %s2316_s25 = smov [#allocation4]  }
 0x456   : > { %1591 = vrot.lane.b32.xlu0 %v1512_v39, %s2313_s14  ;;  %1589 = vrot.lane.b32.xlu1 %v1510_v56, %s2313_s14  ;;  %p2245_p1 = scmp.ne.s32.totalorder %s2975_s16, %s2244_s13  ;;  %s2248_s17 = sshll.u32 %s2316_s25, 4  ;;  %s2249_s17 = int_to_ptr.vmem [resolvable:$false] %s2248_s17 }
 0x457   : > { %s2250_s18 = scalar_lea.vmem %s2249_s17, 4096  ;;  %p2251_p4 = scmp.lt.s32.totalorder %s2975_s16, %s2249_s17 }
 0x458   : > { %p2246_p2 = pnand %p2245_p1, %p2390_p5  ;;  %p2252_p7 = scmp.lt.s32.totalorder %s2250_s18, %s2244_s13 }
 0x45a   : > { %1593 = vrot.lane.b32.xlu1 %v1514_v59, %s2313_s14  ;;  %p2247_p3 = pneg %p2246_p2  ;;  %p2253_p8 = por %p2252_p7, %p2251_p4 }
 0x45c   : > { %p2254_p9 = pnand %p2253_p8, %p2247_p3 }
 0x49f   : > { %v1568_v60 = vpop.permute.xlu1 %1567 }
 0x4a0   : > { %1614 = vst.msk [vmem:[%s2540_s29 + $0x10] sm:$0xff] %vm1611_vm4, %v1568_v60 }
 0x4a4   : > { %v1564_v6 = vpop.permute.xlu0 %1563 }
 0x4a5   : > { %1612 = vst.msk [vmem:[%s2540_s29] sm:$0xff] %vm1611_vm4, %v1564_v6  ;;  %v1570_v51 = vpop.permute.xlu1 %1569 }
 0x4a6   : > { %1615 = vst.msk [vmem:[%s2540_s29 + $0x18] sm:$0xff] %vm1611_vm4, %v1570_v51 }
 0x4a8   : > { %v1576_v38 = vpop.permute.xlu0 %1575 }
 0x4a9   : > { %1618 = vst.msk [vmem:[%s2540_s29 + $0x30] sm:$0xff] %vm1611_vm4, %v1576_v38  ;;  %v1566_v14 = vpop.permute.xlu1 %1565 }
 0x4aa   : > { %1613 = vst.msk [vmem:[%s2540_s29 + $0x8] sm:$0xff] %vm1611_vm4, %v1566_v14 }
 0x4ac   : > { %v1572_v19 = vpop.permute.xlu0 %1571 }
 0x4ad   : > { %1616 = vst.msk [vmem:[%s2540_s29 + $0x20] sm:$0xff] %vm1611_vm4, %v1572_v19  ;;  %v1578_v1 = vpop.permute.xlu1 %1577 }
 0x4ae   : > { %1619 = vst.msk [vmem:[%s2540_s29 + $0x38] sm:$0xff] %vm1611_vm4, %v1578_v1 }
 0x4b0   : > { %v1584_v62 = vpop.permute.xlu0 %1583 }
 0x4b1   : > { %1622 = vst.msk [vmem:[%s2540_s29 + $0x50] sm:$0xff] %vm1611_vm4, %v1584_v62  ;;  %v1574_v3 = vpop.permute.xlu1 %1573 }
 0x4b2   : > { %1617 = vst.msk [vmem:[%s2540_s29 + $0x28] sm:$0xff] %vm1611_vm4, %v1574_v3 }
 0x4b4   : > { %v1580_v26 = vpop.permute.xlu0 %1579 }
 0x4b5   : > { %1620 = vst.msk [vmem:[%s2540_s29 + $0x40] sm:$0xff] %vm1611_vm4, %v1580_v26  ;;  %v1586_v23 = vpop.permute.xlu1 %1585 }
 0x4b6   : > { %1623 = vst.msk [vmem:[%s2540_s29 + $0x58] sm:$0xff] %vm1611_vm4, %v1586_v23 }
 0x4c4   : > { %v1588_v58 = vpop.permute.xlu0 %1587  ;;  %v1582_v63 = vpop.permute.xlu1 %1581 }
 0x4c5   : > { %1624 = vst.msk [vmem:[%s2540_s29 + $0x60] sm:$0xff] %vm1611_vm4, %v1588_v58  ;;  %1621 = vst.msk [vmem:[%s2540_s29 + $0x48] sm:$0xff] %vm1611_vm4, %v1582_v63 }
 0x4c8   : > { %v1592_v54 = vpop.permute.xlu0 %1591  ;;  %v1590_v8 = vpop.permute.xlu1 %1589 }
 0x4c9   : > { %1626 = vst.msk [vmem:[%s2540_s29 + $0x70] sm:$0xff] %vm1611_vm4, %v1592_v54  ;;  %1625 = vst.msk [vmem:[%s2540_s29 + $0x68] sm:$0xff] %vm1611_vm4, %v1590_v8 }
 0x4cc   : > { %v1594_v9 = vpop.permute.xlu1 %1593 }
 0x4cd   : > { %1627 = vst.msk [vmem:[%s2540_s29 + $0x78] sm:$0xff] %vm1611_vm4, %v1594_v9 }
 0x4ce   : > { %2257 = shalt.err (!%p2254_p9)
}
 0x4cf   : > { %s2258_s29 = scalar_lea.hbm %s2973_s11, 2048  ;;  %s2262_s10 = scalar_lea.hbm %s3029_s6, 4096 }
 0x4d0   : > { %p2259_p10 = scmp.ne.s32.totalorder %s2973_s11, %s2258_s29  ;;  %p2263_p13 = scmp.lt.u32.totalorder %s2973_s11, %s3029_s6 }
 0x4d1   : > { %p2264_p0 = scmp.lt.u32.totalorder %s2262_s10, %s2258_s29  ;;  %p2266_p2 = scmp.lt.u32.totalorder %s2258_s29, %s2973_s11 }
 0x4d2   : > { %p2260_p11 = pnand %p2259_p10, %p2390_p5 }
 0x4d3   : > { %p2265_p1 = por %p2264_p0, %p2263_p13 }
 0x4d4   : > { %p2261_p12 = pneg %p2260_p11 }
 0x4d5   : > { %p2267_p3 = por %p2266_p2, %p2265_p1 }
 0x4d7   : > { %p2268_p4 = pnand %p2267_p3, %p2261_p12 }
 0x4d9   : > { %2271 = shalt.err (!%p2268_p4)
}
 0x4da   : > { %2010 = dma.vmem_to_hbm [thread:$0]  (%p2390_p5), %s2975_s16, 2048, %s2973_s11, %s1634_s12, %s2315_s28, %s2315_s28, %s2313_s14  }
 0x4db PF: > { %p2020_p7 = scmp.ge.s32.totalorder %s2310_s24, 2  ;;  %s1680_s13 = sand.u32 1, %s2298_s21  }
 0x4dc   : > { %s1681_s25 = scalar_lea.sflag [#allocation3], %s1680_s13 }
 0x4dd   : > { %p2014_p8 = pnand %p2020_p7, %p2394_p6 }
 0x4df   : > { %2289 = dma.done.wait (!%p2014_p8), %s1681_s25, 2048  }
 0x4e0   : > { %2291 = vsyncadd (!%p2014_p8), %s1681_s25, 4294965248  ;;  %s1690_s7 = scalar_lea.sflag [#allocation5], %s1680_s13 }
 0x4e1   : > { %2293 = dma.done.wait (!%p2014_p8), %s1690_s7, 2048  }
 0x4e2   : > { %2295 = vsyncadd (!%p2014_p8), %s1690_s7, 4294965248  ;;  %p20_p5 = scmp.ge.s32.totalorder %s2377_s27, 4   ;;  %s3032_s21 = smov %s2302_s22 }
 0x4e3   : > { %s3033_s22 = smov %s2306_s23  ;;  %s3034_s23 = smov %s2388_s30 }
 0x4e4   : > { %s3035_s24 = smov %s2377_s27  ;;  %22 = sbr.rel (!%p20_p5) target bundleno = 5 (0x5), region = 95 }
 0x4eb   :  { %1695 = vsyncpa [#allocation3], 1 }
 0x4ec   :  { %1697 = vsyncpa [#allocation3 + $0x1], 1 }
 0x4ed   :  { %1698 = vsyncpa [#allocation5], 1 }
 0x4ee   :  { %1700 = vsyncpa [#allocation5 + $0x1], 1 }

</bundles_post_ra>
